<compile_context>
chip_gen: v6e
topology: v6e:2x2x1
jax: 0.10.0
libtpu: 0.0.40
codegen_flags: <defaults>
</compile_context>

<pallas_src>
import functools
import math

import jax
import jax.numpy as jnp
from jax import lax
from jax.experimental import pallas as pl
from jax.experimental.pallas import tpu as pltpu

NEG_INF = -1e9  # matches the torch module's masked_fill value


def _round_up(x, m):
    return ((x + m - 1) // m) * m


def mha_kernel(rowmask_ref, q_ref, k_ref, v_ref,
               wq_ref, bq_ref, wk_ref, bk_ref, wv_ref, bv_ref,
               wo_ref, bo_ref, o_ref, kproj_ref, vproj_ref, *, heads, d_k):
    f32 = jnp.float32
    bf16 = jnp.bfloat16

    # ---- K/V projections: computed once per batch element (first q tile) and
    # cached in bf16 VMEM scratch; reused by every subsequent q tile. ----
    @pl.when(pl.program_id(1) == 0)
    def _():
        xk = k_ref[0]                                   # (Sk, D) bf16
        xv = v_ref[0]
        kp = jnp.dot(xk, wk_ref[...], preferred_element_type=f32) + bk_ref[0]
        vp = jnp.dot(xv, wv_ref[...], preferred_element_type=f32) + bv_ref[0]
        kproj_ref[...] = kp.astype(bf16)
        vproj_ref[...] = vp.astype(bf16)

    xq = q_ref[0]                                       # (tq, D) bf16
    tq = xq.shape[0]
    sk = kproj_ref.shape[0]

    # ---- Q projection (1/sqrt(d_k) already folded into wq/bq host-side) ----
    qp = jnp.dot(xq, wq_ref[...], preferred_element_type=f32) + bq_ref[0]

    q3 = qp.reshape(tq, heads, d_k).astype(bf16)        # (tq, H, d_k)
    k3 = kproj_ref[...].reshape(sk, heads, d_k)         # (Sk, H, d_k) bf16
    v3 = vproj_ref[...].reshape(sk, heads, d_k)

    # ---- scores for all heads in one contraction: batch H, contract d_k ----
    # (tq, H, d_k) x (Sk, H, d_k) -> (H, tq, Sk)
    scores = lax.dot_general(
        q3, k3,
        dimension_numbers=(((2,), (2,)), ((1,), (1,))),
        preferred_element_type=f32)

    # ---- torch mask semantics: query row masked iff sum(mask[row]) == 0 ----
    row_masked = rowmask_ref[0] > 0.0                   # (tq, 1) -> bcast over (H, tq, Sk)
    scores = jnp.where(row_masked, NEG_INF, scores)

    # ---- softmax in f32, denominator reciprocal on the EUP ----
    m = jnp.max(scores, axis=-1, keepdims=True)
    e = jnp.exp(scores - m)
    p = e * pl.reciprocal(jnp.sum(e, axis=-1, keepdims=True), approx=True)

    # ---- attention output per head: (H,tq,Sk) x (Sk,H,d_k) -> (H,tq,d_k) ----
    attn = lax.dot_general(
        p.astype(bf16), v3,
        dimension_numbers=(((2,), (0,)), ((0,), (1,))),
        preferred_element_type=f32)

    # ---- head merge + output projection with no XLU transpose / relayout:
    # per-head (tq,d_k)x(d_k,D) batched over H, then a cheap sum over heads ----
    out_h = lax.dot_general(
        attn.astype(bf16), wo_ref[...],
        dimension_numbers=(((2,), (1,)), ((0,), (0,))),
        preferred_element_type=f32)                     # (H, tq, D)
    out = jnp.sum(out_h, axis=0) + bo_ref[0]

    # nn.Dropout is identity in eval mode.
    # TODO(synk): training-mode dropout on the attention probabilities is not implemented.
    o_ref[0] = out.astype(o_ref.dtype)


def _vmem_budget_bytes():
    """75% of physical per-core VMEM (64 MiB on v7x, 128 MiB on v5e/v6e)."""
    try:
        cap = pltpu.get_tpu_info().vmem_capacity_bytes
    except Exception:
        cap = 64 << 20          # conservative fallback (v7x per-TC VMEM)
    return int(0.75 * cap)


def _vmem_estimate_bytes(tq, sk, d, heads):
    bf, f4 = 2, 4
    blocks = (2 * tq * f4                 # row-mask block (double buffered)
              + 2 * tq * d * bf           # q block
              + 2 * 2 * sk * d * bf       # k + v blocks
              + 4 * d * d * bf            # weights (single buffered)
              + 4 * d * f4                # biases
              + 2 * tq * d * f4)          # output block
    scratch = 2 * sk * d * bf             # cached projected K/V
    interm = (3 * heads * tq * sk * f4    # scores / exp / probs (f32)
              + 2 * sk * d * f4           # kp/vp f32 before the bf16 cast
              + heads * tq * d * f4       # per-head projected output
              + 4 * tq * d * f4)          # qp / q3 / out temporaries (slack)
    return blocks + scratch + interm


def multi_head_attention(q, k, v, params, *, heads, mask=None, q_tile=128):
    """q: (B, Sq, D), k/v: (B, Sk, D), mask: (B, Sq, Sk) or None.

    `params` must come from `prepare_params` (bf16 weights, 1/sqrt(d_k) folded
    into wq/bq, wo pre-reshaped to (H, d_k, D))."""
    B, Sq, D = q.shape
    Sk = k.shape[1]
    d_k = D // heads

    # torch's mask path only uses sum(mask, -1) == 0 (whole-query masking):
    # reduce it host-side to a (B, Sq, 1) flag so the kernel never sees (Sq, Sk).
    if mask is None:
        rowmask = jnp.zeros((B, Sq, 1), jnp.float32)
    else:
        rowmask = (jnp.sum(mask.astype(jnp.float32), axis=-1, keepdims=True)
                   == 0.0).astype(jnp.float32)

    # --- q-tile selection: multiple of 8; shrink while over the VMEM budget ---
    budget = _vmem_budget_bytes()
    tq = _round_up(min(q_tile, _round_up(Sq, 8)), 8)
    while tq > 8 and _vmem_estimate_bytes(tq, Sk, D, heads) > budget:
        tq = _round_up(max(8, tq // 2), 8)
    # TODO(synk): for very long Sk the whole-Sk K/V + (H,tq,Sk) scores may still
    # not fit VMEM (esp. v7x); an Sk (flash) grid axis with online softmax would
    # be needed there.

    # Pad Sq up to a multiple of the tile (pad rows are sliced off afterwards).
    sq_pad = _round_up(Sq, tq)
    if sq_pad != Sq:
        q = jnp.pad(q, ((0, 0), (0, sq_pad - Sq), (0, 0)))
        rowmask = jnp.pad(rowmask, ((0, 0), (0, sq_pad - Sq), (0, 0)))
    n_q_tiles = sq_pad // tq

    # bf16 activations: halves HBM->VMEM DMA (weights are already bf16).
    qb = q.astype(jnp.bfloat16)
    kb = k.astype(jnp.bfloat16)
    vb = v.astype(jnp.bfloat16)

    vmem_limit = int(min(budget,
                         max(16 << 20,
                             _vmem_estimate_bytes(tq, Sk, D, heads) + (4 << 20))))

    kernel = functools.partial(mha_kernel, heads=heads, d_k=d_k)

    def build(single_buffer_weights):
        const_kw = (dict(pipeline_mode=pl.Buffered(1))
                    if single_buffer_weights else {})
        mask_spec = pl.BlockSpec((1, tq, 1), lambda b, i: (b, i, 0))
        per_q = pl.BlockSpec((1, tq, D), lambda b, i: (b, i, 0))
        per_kv = pl.BlockSpec((1, Sk, D), lambda b, i: (b, 0, 0))
        w_spec = pl.BlockSpec((D, D), lambda b, i: (0, 0), **const_kw)
        b_spec = pl.BlockSpec((1, D), lambda b, i: (0, 0), **const_kw)
        wo_spec = pl.BlockSpec((heads, d_k, D), lambda b, i: (0, 0, 0), **const_kw)
        return pl.pallas_call(
            kernel,
            out_shape=jax.ShapeDtypeStruct((B, sq_pad, D), jnp.float32),
            grid=(B, n_q_tiles),
            in_specs=[mask_spec, per_q, per_kv, per_kv,
                      w_spec, b_spec, w_spec, b_spec, w_spec, b_spec,
                      wo_spec, b_spec],
            out_specs=pl.BlockSpec((1, tq, D), lambda b, i: (b, i, 0)),
            scratch_shapes=[pltpu.VMEM((Sk, D), jnp.bfloat16),   # cached K proj
                            pltpu.VMEM((Sk, D), jnp.bfloat16)],  # cached V proj
            compiler_params=pltpu.CompilerParams(
                # batch axis parallel (megacore), q axis arbitrary so the
                # per-batch K/V scratch caching is sequential & correct.
                dimension_semantics=("parallel", "arbitrary"),
                vmem_limit_bytes=vmem_limit),
        )

    args = (rowmask, qb, kb, vb,
            params["wq"], params["bq"], params["wk"], params["bk"],
            params["wv"], params["bv"], params["wo"], params["bo"])
    try:
        out = build(True)(*args)
    except Exception:
        # pl.Buffered(1) (single-buffered grid-invariant weights) not supported
        # by this jax build; fall back to default double buffering.
        out = build(False)(*args)

    return out[:, :Sq, :]


def init_params(key, d_model):
    """nn.Linear-style init; weights stored (in, out) so the kernel does x @ W + b."""
    def linear(k):
        bound = 1.0 / math.sqrt(d_model)
        kw, kb = jax.random.split(k)
        w = jax.random.uniform(kw, (d_model, d_model), jnp.float32, -bound, bound)
        b = jax.random.uniform(kb, (1, d_model), jnp.float32, -bound, bound)
        return w, b

    k1, k2, k3, k4 = jax.random.split(key, 4)
    wq, bq = linear(k1)
    wk, bk = linear(k2)
    wv, bv = linear(k3)
    wo, bo = linear(k4)
    return dict(wq=wq, bq=bq, wk=wk, bk=bk, wv=wv, bv=bv, wo=wo, bo=bo)


def prepare_params(params, heads):
    """One-time fold: 1/sqrt(d_k) into wq/bq, bf16 weights, wo -> (H, d_k, D)."""
    D = params["wq"].shape[0]
    d_k = D // heads
    scale = jnp.float32(1.0 / math.sqrt(d_k))
    bf16 = jnp.bfloat16
    return dict(
        wq=(params["wq"] * scale).astype(bf16),
        bq=(params["bq"] * scale).astype(jnp.float32),
        wk=params["wk"].astype(bf16),
        bk=params["bk"].astype(jnp.float32),
        wv=params["wv"].astype(bf16),
        bv=params["bv"].astype(jnp.float32),
        wo=params["wo"].reshape(heads, d_k, D).astype(bf16),
        bo=params["bo"].astype(jnp.float32),
    )


def reference_mha(q, k, v, params, heads, mask=None):
    """Pure-JAX f32 replica of the torch module's forward (eval mode)."""
    B, Sq, D = q.shape
    Sk = k.shape[1]
    d_k = D // heads
    qp = q @ params["wq"] + params["bq"]
    kp = k @ params["wk"] + params["bk"]
    vp = v @ params["wv"] + params["bv"]
    q4 = qp.reshape(B, Sq, heads, d_k).transpose(0, 2, 1, 3)
    k4 = kp.reshape(B, Sk, heads, d_k).transpose(0, 2, 1, 3)
    v4 = vp.reshape(B, Sk, heads, d_k).transpose(0, 2, 1, 3)
    scores = jnp.einsum("bhqd,bhkd->bhqk", q4, k4) / math.sqrt(d_k)
    if mask is not None:
        rowsum = jnp.sum(mask.astype(jnp.float32), axis=-1)       # (B, Sq)
        masked = (rowsum == 0.0)[:, None, :, None]                # (B, 1, Sq, 1)
        scores = jnp.where(masked, NEG_INF, scores)
    p = jax.nn.softmax(scores, axis=-1)
    attn = jnp.einsum("bhqk,bhkd->bhqd", p, v4)
    concat = attn.transpose(0, 2, 1, 3).reshape(B, Sq, D)
    return concat @ params["wo"] + params["bo"]


if __name__ == "__main__":
    # Small shapes consistent with the module: batch=2, seq=8, d_model=32, heads=4.
    B, S, D, H = 2, 8, 32, 4

    key = jax.random.PRNGKey(0)
    kx, kparam = jax.random.split(key)
    x = jax.random.normal(kx, (B, S, D), jnp.float32)

    # (B, S, S) mask as the torch module expects; fully mask the last query row
    # of batch 1 to exercise the masking path (that row -> uniform attention).
    mask = jnp.ones((B, S, S), jnp.float32)
    mask = mask.at[1, -1, :].set(0.0)

    raw_params = init_params(kparam, D)
    params = prepare_params(raw_params, H)

    out_masked = multi_head_attention(x, x, x, params, heads=H, mask=mask)
    out_nomask = multi_head_attention(x, x, x, params, heads=H, mask=None)
    jax.block_until_ready((out_masked, out_nomask))

    ref_masked = reference_mha(x, x, x, raw_params, H, mask=mask)
    ref_nomask = reference_mha(x, x, x, raw_params, H, mask=None)

    assert out_masked.shape == (B, S, D)
    assert bool(jnp.all(jnp.isfinite(out_masked)))
    # bf16 MXU feed + approx reciprocal vs f32 reference: tolerance ~5e-2.
    assert bool(jnp.allclose(out_masked, ref_masked, atol=5e-2, rtol=5e-2)), \
        float(jnp.max(jnp.abs(out_masked - ref_masked)))
    assert bool(jnp.allclose(out_nomask, ref_nomask, atol=5e-2, rtol=5e-2)), \
        float(jnp.max(jnp.abs(out_nomask - ref_nomask)))
    print("KERNEL_OK")
</pallas_src>

<mosaic_0001>
module attributes {stable_mosaic.version = 11 : i64} {
  func.func @mha_kernel(%arg0: i32, %arg1: i32, %arg2: memref<1x8x1xf32, #tpu.memory_space<vmem>>, %arg3: memref<1x8x32xbf16, #tpu.memory_space<vmem>>, %arg4: memref<1x8x32xbf16, #tpu.memory_space<vmem>>, %arg5: memref<1x8x32xbf16, #tpu.memory_space<vmem>>, %arg6: memref<32x32xbf16, #tpu.memory_space<vmem>>, %arg7: memref<1x32xf32, #tpu.memory_space<vmem>>, %arg8: memref<32x32xbf16, #tpu.memory_space<vmem>>, %arg9: memref<1x32xf32, #tpu.memory_space<vmem>>, %arg10: memref<32x32xbf16, #tpu.memory_space<vmem>>, %arg11: memref<1x32xf32, #tpu.memory_space<vmem>>, %arg12: memref<4x8x32xbf16, #tpu.memory_space<vmem>>, %arg13: memref<1x32xf32, #tpu.memory_space<vmem>>, %arg14: memref<1x8x32xf32, #tpu.memory_space<vmem>>, %arg15: memref<8x32xbf16, #tpu.memory_space<vmem>>, %arg16: memref<8x32xbf16, #tpu.memory_space<vmem>>) attributes {dimension_semantics = [#tpu.dimension_semantics<parallel>, #tpu.dimension_semantics<arbitrary>], iteration_bounds = array<i64: 2, 1>, scalar_prefetch = 0 : i64, scratch_operands = 2 : i64, tpu.core_type = #tpu.core_type<tc>, window_params = [{transform_indices = @transform_0, window_bounds = array<i64: 1, 8, 1>}, {transform_indices = @transform_1, window_bounds = array<i64: 1, 8, 32>}, {transform_indices = @transform_2, window_bounds = array<i64: 1, 8, 32>}, {transform_indices = @transform_3, window_bounds = array<i64: 1, 8, 32>}, {pipeline_mode = #tpu.pipeline_mode<synchronous>, transform_indices = @transform_4, window_bounds = array<i64: 32, 32>}, {pipeline_mode = #tpu.pipeline_mode<synchronous>, transform_indices = @transform_5, window_bounds = array<i64: 1, 32>}, {pipeline_mode = #tpu.pipeline_mode<synchronous>, transform_indices = @transform_6, window_bounds = array<i64: 32, 32>}, {pipeline_mode = #tpu.pipeline_mode<synchronous>, transform_indices = @transform_7, window_bounds = array<i64: 1, 32>}, {pipeline_mode = #tpu.pipeline_mode<synchronous>, transform_indices = @transform_8, window_bounds = array<i64: 32, 32>}, {pipeline_mode = #tpu.pipeline_mode<synchronous>, transform_indices = @transform_9, window_bounds = array<i64: 1, 32>}, {pipeline_mode = #tpu.pipeline_mode<synchronous>, transform_indices = @transform_10, window_bounds = array<i64: 4, 8, 32>}, {pipeline_mode = #tpu.pipeline_mode<synchronous>, transform_indices = @transform_11, window_bounds = array<i64: 1, 32>}, {transform_indices = @transform_12, window_bounds = array<i64: 1, 8, 32>}]} {
    %c0_i32 = arith.constant 0 : i32
    %0 = arith.cmpi eq, %arg1, %c0_i32 : i32
    %1 = arith.extui %0 : i1 to i32
    %c0_i32_0 = arith.constant 0 : i32
    %2 = arith.cmpi ne, %1, %c0_i32_0 : i32
    scf.if %2 {
      %c0_30 = arith.constant 0 : index
      %c0_31 = arith.constant 0 : index
      %c0_32 = arith.constant 0 : index
      %51 = vector.load %arg4[%c0_30, %c0_31, %c0_32] : memref<1x8x32xbf16, #tpu.memory_space<vmem>>, vector<1x8x32xbf16>
      %52 = vector.shape_cast %51 : vector<1x8x32xbf16> to vector<8x32xbf16>
      %c0_33 = arith.constant 0 : index
      %c0_34 = arith.constant 0 : index
      %c0_35 = arith.constant 0 : index
      %53 = vector.load %arg5[%c0_33, %c0_34, %c0_35] : memref<1x8x32xbf16, #tpu.memory_space<vmem>>, vector<1x8x32xbf16>
      %54 = vector.shape_cast %53 : vector<1x8x32xbf16> to vector<8x32xbf16>
      %c0_36 = arith.constant 0 : index
      %c0_37 = arith.constant 0 : index
      %55 = vector.load %arg8[%c0_36, %c0_37] : memref<32x32xbf16, #tpu.memory_space<vmem>>, vector<32x32xbf16>
      %cst_38 = arith.constant dense<0.000000e+00> : vector<8x32xf32>
      %56 = tpu.matmul %52, %55, %cst_38 {dimension_numbers = #tpu.dot_dimension_numbers<[1], [0], [0], [1], [0, 0, 1, 1], [], []>} : vector<8x32xbf16>, vector<32x32xbf16>, vector<8x32xf32> -> vector<8x32xf32>
      %c0_39 = arith.constant 0 : index
      %c0_40 = arith.constant 0 : index
      %57 = vector.load %arg9[%c0_39, %c0_40] : memref<1x32xf32, #tpu.memory_space<vmem>>, vector<1x32xf32>
      %58 = vector.shape_cast %57 : vector<1x32xf32> to vector<32xf32>
      %59 = vector.shape_cast %58 : vector<32xf32> to vector<1x32xf32>
      %60 = vector.broadcast %59 : vector<1x32xf32> to vector<8x32xf32>
      %61 = arith.addf %56, %60 : vector<8x32xf32>
      %c0_41 = arith.constant 0 : index
      %c0_42 = arith.constant 0 : index
      %62 = vector.load %arg10[%c0_41, %c0_42] : memref<32x32xbf16, #tpu.memory_space<vmem>>, vector<32x32xbf16>
      %cst_43 = arith.constant dense<0.000000e+00> : vector<8x32xf32>
      %63 = tpu.matmul %54, %62, %cst_43 {dimension_numbers = #tpu.dot_dimension_numbers<[1], [0], [0], [1], [0, 0, 1, 1], [], []>} : vector<8x32xbf16>, vector<32x32xbf16>, vector<8x32xf32> -> vector<8x32xf32>
      %c0_44 = arith.constant 0 : index
      %c0_45 = arith.constant 0 : index
      %64 = vector.load %arg11[%c0_44, %c0_45] : memref<1x32xf32, #tpu.memory_space<vmem>>, vector<1x32xf32>
      %65 = vector.shape_cast %64 : vector<1x32xf32> to vector<32xf32>
      %66 = vector.shape_cast %65 : vector<32xf32> to vector<1x32xf32>
      %67 = vector.broadcast %66 : vector<1x32xf32> to vector<8x32xf32>
      %68 = arith.addf %63, %67 : vector<8x32xf32>
      %69 = arith.truncf %61 : vector<8x32xf32> to vector<8x32xbf16>
      %c0_46 = arith.constant 0 : index
      %c0_47 = arith.constant 0 : index
      %70 = vector.load %arg15[%c0_46, %c0_47] : memref<8x32xbf16, #tpu.memory_space<vmem>>, vector<8x32xbf16>
      tpu.vector_store %arg15[%c0_46, %c0_47], %69 {strides = array<i32>} : memref<8x32xbf16, #tpu.memory_space<vmem>>, vector<8x32xbf16>,
      %71 = arith.truncf %68 : vector<8x32xf32> to vector<8x32xbf16>
      %c0_48 = arith.constant 0 : index
      %c0_49 = arith.constant 0 : index
      %72 = vector.load %arg16[%c0_48, %c0_49] : memref<8x32xbf16, #tpu.memory_space<vmem>>, vector<8x32xbf16>
      tpu.vector_store %arg16[%c0_48, %c0_49], %71 {strides = array<i32>} : memref<8x32xbf16, #tpu.memory_space<vmem>>, vector<8x32xbf16>,
    } else {
    }
    %c0 = arith.constant 0 : index
    %c0_1 = arith.constant 0 : index
    %c0_2 = arith.constant 0 : index
    %3 = vector.load %arg3[%c0, %c0_1, %c0_2] : memref<1x8x32xbf16, #tpu.memory_space<vmem>>, vector<1x8x32xbf16>
    %4 = vector.shape_cast %3 : vector<1x8x32xbf16> to vector<8x32xbf16>
    %c0_3 = arith.constant 0 : index
    %c0_4 = arith.constant 0 : index
    %5 = vector.load %arg6[%c0_3, %c0_4] : memref<32x32xbf16, #tpu.memory_space<vmem>>, vector<32x32xbf16>
    %cst = arith.constant dense<0.000000e+00> : vector<8x32xf32>
    %6 = tpu.matmul %4, %5, %cst {dimension_numbers = #tpu.dot_dimension_numbers<[1], [0], [0], [1], [0, 0, 1, 1], [], []>} : vector<8x32xbf16>, vector<32x32xbf16>, vector<8x32xf32> -> vector<8x32xf32>
    %c0_5 = arith.constant 0 : index
    %c0_6 = arith.constant 0 : index
    %7 = vector.load %arg7[%c0_5, %c0_6] : memref<1x32xf32, #tpu.memory_space<vmem>>, vector<1x32xf32>
    %8 = vector.shape_cast %7 : vector<1x32xf32> to vector<32xf32>
    %9 = vector.shape_cast %8 : vector<32xf32> to vector<1x32xf32>
    %10 = vector.broadcast %9 : vector<1x32xf32> to vector<8x32xf32>
    %11 = arith.addf %6, %10 : vector<8x32xf32>
    %12 = vector.shape_cast %11 : vector<8x32xf32> to vector<8x4x8xf32>
    %13 = arith.truncf %12 : vector<8x4x8xf32> to vector<8x4x8xbf16>
    %c0_7 = arith.constant 0 : index
    %c0_8 = arith.constant 0 : index
    %14 = vector.load %arg15[%c0_7, %c0_8] : memref<8x32xbf16, #tpu.memory_space<vmem>>, vector<8x32xbf16>
    %15 = vector.shape_cast %14 : vector<8x32xbf16> to vector<8x4x8xbf16>
    %c0_9 = arith.constant 0 : index
    %c0_10 = arith.constant 0 : index
    %16 = vector.load %arg16[%c0_9, %c0_10] : memref<8x32xbf16, #tpu.memory_space<vmem>>, vector<8x32xbf16>
    %17 = vector.shape_cast %16 : vector<8x32xbf16> to vector<8x4x8xbf16>
    %cst_11 = arith.constant dense<0.000000e+00> : vector<4x8x8xf32>
    %18 = tpu.matmul %13, %15, %cst_11 {dimension_numbers = #tpu.dot_dimension_numbers<[2], [2], [0], [0], [0, 1, 0, 0, 1, 0], [1], [1]>} : vector<8x4x8xbf16>, vector<8x4x8xbf16>, vector<4x8x8xf32> -> vector<4x8x8xf32>
    %c0_12 = arith.constant 0 : index
    %c0_13 = arith.constant 0 : index
    %c0_14 = arith.constant 0 : index
    %19 = vector.load %arg2[%c0_12, %c0_13, %c0_14] : memref<1x8x1xf32, #tpu.memory_space<vmem>>, vector<1x8x1xf32>
    %20 = vector.shape_cast %19 : vector<1x8x1xf32> to vector<8x1xf32>
    %cst_15 = arith.constant 0.000000e+00 : f32
    %21 = vector.broadcast %cst_15 : f32 to vector<8x1xf32>
    %22 = arith.cmpf ogt, %20, %21 : vector<8x1xf32>
    %cst_16 = arith.constant -1.000000e+09 : f32
    %23 = vector.shape_cast %22 : vector<8x1xi1> to vector<1x8x1xi1>
    %24 = vector.broadcast %23 : vector<1x8x1xi1> to vector<4x8x8xi1>
    %25 = vector.broadcast %cst_16 : f32 to vector<4x8x8xf32>
    %26 = arith.select %24, %25, %18 : vector<4x8x8xi1>, vector<4x8x8xf32>
    %cst_17 = arith.constant dense<0xFF800000> : vector<4x8xf32>
    %27 = vector.multi_reduction <maximumf>, %26, %cst_17 [2] : vector<4x8x8xf32> to vector<4x8xf32>
    %28 = vector.shape_cast %27 : vector<4x8xf32> to vector<4x8x1xf32>
    %29 = vector.broadcast %28 : vector<4x8x1xf32> to vector<4x8x8xf32>
    %30 = arith.subf %26, %29 : vector<4x8x8xf32>
    %31 = math.exp %30 : vector<4x8x8xf32>
    %cst_18 = arith.constant dense<0.000000e+00> : vector<4x8xf32>
    %32 = vector.multi_reduction <add>, %31, %cst_18 [2] : vector<4x8x8xf32> to vector<4x8xf32>
    %33 = vector.shape_cast %32 : vector<4x8xf32> to vector<4x8x1xf32>
    %34 = tpu.reciprocal %33 {approx = true} : vector<4x8x1xf32> -> vector<4x8x1xf32>
    %35 = vector.broadcast %34 : vector<4x8x1xf32> to vector<4x8x8xf32>
    %36 = arith.mulf %31, %35 : vector<4x8x8xf32>
    %37 = arith.truncf %36 : vector<4x8x8xf32> to vector<4x8x8xbf16>
    %cst_19 = arith.constant dense<0.000000e+00> : vector<4x8x8xf32>
    %38 = tpu.matmul %37, %17, %cst_19 {dimension_numbers = #tpu.dot_dimension_numbers<[2], [0], [1], [2], [0, 0, 0, 1, 1, 2], [0], [1]>} : vector<4x8x8xbf16>, vector<8x4x8xbf16>, vector<4x8x8xf32> -> vector<4x8x8xf32>
    %39 = arith.truncf %38 : vector<4x8x8xf32> to vector<4x8x8xbf16>
    %c0_20 = arith.constant 0 : index
    %c0_21 = arith.constant 0 : index
    %c0_22 = arith.constant 0 : index
    %40 = vector.load %arg12[%c0_20, %c0_21, %c0_22] : memref<4x8x32xbf16, #tpu.memory_space<vmem>>, vector<4x8x32xbf16>
    %cst_23 = arith.constant dense<0.000000e+00> : vector<4x8x32xf32>
    %41 = tpu.matmul %39, %40, %cst_23 {dimension_numbers = #tpu.dot_dimension_numbers<[2], [1], [1], [2], [0, 0, 0, 1, 1, 2], [0], [0]>} : vector<4x8x8xbf16>, vector<4x8x32xbf16>, vector<4x8x32xf32> -> vector<4x8x32xf32>
    %cst_24 = arith.constant dense<0.000000e+00> : vector<8x32xf32>
    %42 = vector.multi_reduction <add>, %41, %cst_24 [0] : vector<4x8x32xf32> to vector<8x32xf32>
    %c0_25 = arith.constant 0 : index
    %c0_26 = arith.constant 0 : index
    %43 = vector.load %arg13[%c0_25, %c0_26] : memref<1x32xf32, #tpu.memory_space<vmem>>, vector<1x32xf32>
    %44 = vector.shape_cast %43 : vector<1x32xf32> to vector<32xf32>
    %45 = vector.shape_cast %44 : vector<32xf32> to vector<1x32xf32>
    %46 = vector.broadcast %45 : vector<1x32xf32> to vector<8x32xf32>
    %47 = arith.addf %42, %46 : vector<8x32xf32>
    %c0_27 = arith.constant 0 : index
    %c0_28 = arith.constant 0 : index
    %c0_29 = arith.constant 0 : index
    %48 = vector.load %arg14[%c0_27, %c0_28, %c0_29] : memref<1x8x32xf32, #tpu.memory_space<vmem>>, vector<1x8x32xf32>
    %49 = vector.shape_cast %48 : vector<1x8x32xf32> to vector<8x32xf32>
    %50 = vector.shape_cast %47 : vector<8x32xf32> to vector<1x8x32xf32>
    tpu.vector_store %arg14[%c0_27, %c0_28, %c0_29], %50 {strides = array<i32>} : memref<1x8x32xf32, #tpu.memory_space<vmem>>, vector<1x8x32xf32>,
    return
  }
  func.func @transform_0(%arg0: i32, %arg1: i32) -> (i32, i32, i32) {
    %c0_i32 = arith.constant 0 : i32
    %c0_i32_0 = arith.constant 0 : i32
    return %arg0, %arg1, %c0_i32 : i32, i32, i32
  }
  func.func @transform_1(%arg0: i32, %arg1: i32) -> (i32, i32, i32) {
    %c0_i32 = arith.constant 0 : i32
    %c0_i32_0 = arith.constant 0 : i32
    return %arg0, %arg1, %c0_i32 : i32, i32, i32
  }
  func.func @transform_2(%arg0: i32, %arg1: i32) -> (i32, i32, i32) {
    %c0_i32 = arith.constant 0 : i32
    %c0_i32_0 = arith.constant 0 : i32
    %c0_i32_1 = arith.constant 0 : i32
    return %arg0, %c0_i32, %c0_i32_0 : i32, i32, i32
  }
  func.func @transform_3(%arg0: i32, %arg1: i32) -> (i32, i32, i32) {
    %c0_i32 = arith.constant 0 : i32
    %c0_i32_0 = arith.constant 0 : i32
    %c0_i32_1 = arith.constant 0 : i32
    return %arg0, %c0_i32, %c0_i32_0 : i32, i32, i32
  }
  func.func @transform_4(%arg0: i32, %arg1: i32) -> (i32, i32) {
    %c0_i32 = arith.constant 0 : i32
    %c0_i32_0 = arith.constant 0 : i32
    %c0_i32_1 = arith.constant 0 : i32
    return %c0_i32, %c0_i32_0 : i32, i32
  }
  func.func @transform_5(%arg0: i32, %arg1: i32) -> (i32, i32) {
    %c0_i32 = arith.constant 0 : i32
    %c0_i32_0 = arith.constant 0 : i32
    %c0_i32_1 = arith.constant 0 : i32
    return %c0_i32, %c0_i32_0 : i32, i32
  }
  func.func @transform_6(%arg0: i32, %arg1: i32) -> (i32, i32) {
    %c0_i32 = arith.constant 0 : i32
    %c0_i32_0 = arith.constant 0 : i32
    %c0_i32_1 = arith.constant 0 : i32
    return %c0_i32, %c0_i32_0 : i32, i32
  }
  func.func @transform_7(%arg0: i32, %arg1: i32) -> (i32, i32) {
    %c0_i32 = arith.constant 0 : i32
    %c0_i32_0 = arith.constant 0 : i32
    %c0_i32_1 = arith.constant 0 : i32
    return %c0_i32, %c0_i32_0 : i32, i32
  }
  func.func @transform_8(%arg0: i32, %arg1: i32) -> (i32, i32) {
    %c0_i32 = arith.constant 0 : i32
    %c0_i32_0 = arith.constant 0 : i32
    %c0_i32_1 = arith.constant 0 : i32
    return %c0_i32, %c0_i32_0 : i32, i32
  }
  func.func @transform_9(%arg0: i32, %arg1: i32) -> (i32, i32) {
    %c0_i32 = arith.constant 0 : i32
    %c0_i32_0 = arith.constant 0 : i32
    %c0_i32_1 = arith.constant 0 : i32
    return %c0_i32, %c0_i32_0 : i32, i32
  }
  func.func @transform_10(%arg0: i32, %arg1: i32) -> (i32, i32, i32) {
    %c0_i32 = arith.constant 0 : i32
    %c0_i32_0 = arith.constant 0 : i32
    %c0_i32_1 = arith.constant 0 : i32
    %c0_i32_2 = arith.constant 0 : i32
    return %c0_i32, %c0_i32_0, %c0_i32_1 : i32, i32, i32
  }
  func.func @transform_11(%arg0: i32, %arg1: i32) -> (i32, i32) {
    %c0_i32 = arith.constant 0 : i32
    %c0_i32_0 = arith.constant 0 : i32
    %c0_i32_1 = arith.constant 0 : i32
    return %c0_i32, %c0_i32_0 : i32, i32
  }
  func.func @transform_12(%arg0: i32, %arg1: i32) -> (i32, i32, i32) {
    %c0_i32 = arith.constant 0 : i32
    %c0_i32_0 = arith.constant 0 : i32
    return %arg0, %arg1, %c0_i32 : i32, i32, i32
  }
}

module attributes {stable_mosaic.version = 11 : i64} {
  func.func @mha_kernel(%arg0: i32, %arg1: i32, %arg2: memref<1x8x1xf32, #tpu.memory_space<vmem>>, %arg3: memref<1x8x32xbf16, #tpu.memory_space<vmem>>, %arg4: memref<1x8x32xbf16, #tpu.memory_space<vmem>>, %arg5: memref<1x8x32xbf16, #tpu.memory_space<vmem>>, %arg6: memref<32x32xbf16, #tpu.memory_space<vmem>>, %arg7: memref<1x32xf32, #tpu.memory_space<vmem>>, %arg8: memref<32x32xbf16, #tpu.memory_space<vmem>>, %arg9: memref<1x32xf32, #tpu.memory_space<vmem>>, %arg10: memref<32x32xbf16, #tpu.memory_space<vmem>>, %arg11: memref<1x32xf32, #tpu.memory_space<vmem>>, %arg12: memref<4x8x32xbf16, #tpu.memory_space<vmem>>, %arg13: memref<1x32xf32, #tpu.memory_space<vmem>>, %arg14: memref<1x8x32xf32, #tpu.memory_space<vmem>>, %arg15: memref<8x32xbf16, #tpu.memory_space<vmem>>, %arg16: memref<8x32xbf16, #tpu.memory_space<vmem>>) attributes {dimension_semantics = [#tpu.dimension_semantics<parallel>, #tpu.dimension_semantics<arbitrary>], iteration_bounds = array<i64: 2, 1>, scalar_prefetch = 0 : i64, scratch_operands = 2 : i64, tpu.core_type = #tpu.core_type<tc>, window_params = [{transform_indices = @transform_0, window_bounds = array<i64: 1, 8, 1>}, {transform_indices = @transform_1, window_bounds = array<i64: 1, 8, 32>}, {transform_indices = @transform_2, window_bounds = array<i64: 1, 8, 32>}, {transform_indices = @transform_3, window_bounds = array<i64: 1, 8, 32>}, {pipeline_mode = #tpu.pipeline_mode<synchronous>, transform_indices = @transform_4, window_bounds = array<i64: 32, 32>}, {pipeline_mode = #tpu.pipeline_mode<synchronous>, transform_indices = @transform_5, window_bounds = array<i64: 1, 32>}, {pipeline_mode = #tpu.pipeline_mode<synchronous>, transform_indices = @transform_6, window_bounds = array<i64: 32, 32>}, {pipeline_mode = #tpu.pipeline_mode<synchronous>, transform_indices = @transform_7, window_bounds = array<i64: 1, 32>}, {pipeline_mode = #tpu.pipeline_mode<synchronous>, transform_indices = @transform_8, window_bounds = array<i64: 32, 32>}, {pipeline_mode = #tpu.pipeline_mode<synchronous>, transform_indices = @transform_9, window_bounds = array<i64: 1, 32>}, {pipeline_mode = #tpu.pipeline_mode<synchronous>, transform_indices = @transform_10, window_bounds = array<i64: 4, 8, 32>}, {pipeline_mode = #tpu.pipeline_mode<synchronous>, transform_indices = @transform_11, window_bounds = array<i64: 1, 32>}, {transform_indices = @transform_12, window_bounds = array<i64: 1, 8, 32>}]} {
    %c0_i32 = arith.constant 0 : i32
    %0 = arith.cmpi eq, %arg1, %c0_i32 : i32
    %1 = arith.extui %0 : i1 to i32
    %c0_i32_0 = arith.constant 0 : i32
    %2 = arith.cmpi ne, %1, %c0_i32_0 : i32
    scf.if %2 {
      %c0_30 = arith.constant 0 : index
      %c0_31 = arith.constant 0 : index
      %c0_32 = arith.constant 0 : index
      %51 = vector.load %arg4[%c0_30, %c0_31, %c0_32] : memref<1x8x32xbf16, #tpu.memory_space<vmem>>, vector<1x8x32xbf16>
      %52 = vector.shape_cast %51 : vector<1x8x32xbf16> to vector<8x32xbf16>
      %c0_33 = arith.constant 0 : index
      %c0_34 = arith.constant 0 : index
      %c0_35 = arith.constant 0 : index
      %53 = vector.load %arg5[%c0_33, %c0_34, %c0_35] : memref<1x8x32xbf16, #tpu.memory_space<vmem>>, vector<1x8x32xbf16>
      %54 = vector.shape_cast %53 : vector<1x8x32xbf16> to vector<8x32xbf16>
      %c0_36 = arith.constant 0 : index
      %c0_37 = arith.constant 0 : index
      %55 = vector.load %arg8[%c0_36, %c0_37] : memref<32x32xbf16, #tpu.memory_space<vmem>>, vector<32x32xbf16>
      %cst_38 = arith.constant dense<0.000000e+00> : vector<8x32xf32>
      %56 = tpu.matmul %52, %55, %cst_38 {dimension_numbers = #tpu.dot_dimension_numbers<[1], [0], [0], [1], [0, 0, 1, 1], [], []>} : vector<8x32xbf16>, vector<32x32xbf16>, vector<8x32xf32> -> vector<8x32xf32>
      %c0_39 = arith.constant 0 : index
      %c0_40 = arith.constant 0 : index
      %57 = vector.load %arg9[%c0_39, %c0_40] : memref<1x32xf32, #tpu.memory_space<vmem>>, vector<1x32xf32>
      %58 = vector.shape_cast %57 : vector<1x32xf32> to vector<32xf32>
      %59 = vector.shape_cast %58 : vector<32xf32> to vector<1x32xf32>
      %60 = vector.broadcast %59 : vector<1x32xf32> to vector<8x32xf32>
      %61 = arith.addf %56, %60 : vector<8x32xf32>
      %c0_41 = arith.constant 0 : index
      %c0_42 = arith.constant 0 : index
      %62 = vector.load %arg10[%c0_41, %c0_42] : memref<32x32xbf16, #tpu.memory_space<vmem>>, vector<32x32xbf16>
      %cst_43 = arith.constant dense<0.000000e+00> : vector<8x32xf32>
      %63 = tpu.matmul %54, %62, %cst_43 {dimension_numbers = #tpu.dot_dimension_numbers<[1], [0], [0], [1], [0, 0, 1, 1], [], []>} : vector<8x32xbf16>, vector<32x32xbf16>, vector<8x32xf32> -> vector<8x32xf32>
      %c0_44 = arith.constant 0 : index
      %c0_45 = arith.constant 0 : index
      %64 = vector.load %arg11[%c0_44, %c0_45] : memref<1x32xf32, #tpu.memory_space<vmem>>, vector<1x32xf32>
      %65 = vector.shape_cast %64 : vector<1x32xf32> to vector<32xf32>
      %66 = vector.shape_cast %65 : vector<32xf32> to vector<1x32xf32>
      %67 = vector.broadcast %66 : vector<1x32xf32> to vector<8x32xf32>
      %68 = arith.addf %63, %67 : vector<8x32xf32>
      %69 = arith.truncf %61 : vector<8x32xf32> to vector<8x32xbf16>
      %c0_46 = arith.constant 0 : index
      %c0_47 = arith.constant 0 : index
      %70 = vector.load %arg15[%c0_46, %c0_47] : memref<8x32xbf16, #tpu.memory_space<vmem>>, vector<8x32xbf16>
      tpu.vector_store %arg15[%c0_46, %c0_47], %69 {strides = array<i32>} : memref<8x32xbf16, #tpu.memory_space<vmem>>, vector<8x32xbf16>,
      %71 = arith.truncf %68 : vector<8x32xf32> to vector<8x32xbf16>
      %c0_48 = arith.constant 0 : index
      %c0_49 = arith.constant 0 : index
      %72 = vector.load %arg16[%c0_48, %c0_49] : memref<8x32xbf16, #tpu.memory_space<vmem>>, vector<8x32xbf16>
      tpu.vector_store %arg16[%c0_48, %c0_49], %71 {strides = array<i32>} : memref<8x32xbf16, #tpu.memory_space<vmem>>, vector<8x32xbf16>,
    } else {
    }
    %c0 = arith.constant 0 : index
    %c0_1 = arith.constant 0 : index
    %c0_2 = arith.constant 0 : index
    %3 = vector.load %arg3[%c0, %c0_1, %c0_2] : memref<1x8x32xbf16, #tpu.memory_space<vmem>>, vector<1x8x32xbf16>
    %4 = vector.shape_cast %3 : vector<1x8x32xbf16> to vector<8x32xbf16>
    %c0_3 = arith.constant 0 : index
    %c0_4 = arith.constant 0 : index
    %5 = vector.load %arg6[%c0_3, %c0_4] : memref<32x32xbf16, #tpu.memory_space<vmem>>, vector<32x32xbf16>
    %cst = arith.constant dense<0.000000e+00> : vector<8x32xf32>
    %6 = tpu.matmul %4, %5, %cst {dimension_numbers = #tpu.dot_dimension_numbers<[1], [0], [0], [1], [0, 0, 1, 1], [], []>} : vector<8x32xbf16>, vector<32x32xbf16>, vector<8x32xf32> -> vector<8x32xf32>
    %c0_5 = arith.constant 0 : index
    %c0_6 = arith.constant 0 : index
    %7 = vector.load %arg7[%c0_5, %c0_6] : memref<1x32xf32, #tpu.memory_space<vmem>>, vector<1x32xf32>
    %8 = vector.shape_cast %7 : vector<1x32xf32> to vector<32xf32>
    %9 = vector.shape_cast %8 : vector<32xf32> to vector<1x32xf32>
    %10 = vector.broadcast %9 : vector<1x32xf32> to vector<8x32xf32>
    %11 = arith.addf %6, %10 : vector<8x32xf32>
    %12 = vector.shape_cast %11 : vector<8x32xf32> to vector<8x4x8xf32>
    %13 = arith.truncf %12 : vector<8x4x8xf32> to vector<8x4x8xbf16>
    %c0_7 = arith.constant 0 : index
    %c0_8 = arith.constant 0 : index
    %14 = vector.load %arg15[%c0_7, %c0_8] : memref<8x32xbf16, #tpu.memory_space<vmem>>, vector<8x32xbf16>
    %15 = vector.shape_cast %14 : vector<8x32xbf16> to vector<8x4x8xbf16>
    %c0_9 = arith.constant 0 : index
    %c0_10 = arith.constant 0 : index
    %16 = vector.load %arg16[%c0_9, %c0_10] : memref<8x32xbf16, #tpu.memory_space<vmem>>, vector<8x32xbf16>
    %17 = vector.shape_cast %16 : vector<8x32xbf16> to vector<8x4x8xbf16>
    %cst_11 = arith.constant dense<0.000000e+00> : vector<4x8x8xf32>
    %18 = tpu.matmul %13, %15, %cst_11 {dimension_numbers = #tpu.dot_dimension_numbers<[2], [2], [0], [0], [0, 1, 0, 0, 1, 0], [1], [1]>} : vector<8x4x8xbf16>, vector<8x4x8xbf16>, vector<4x8x8xf32> -> vector<4x8x8xf32>
    %c0_12 = arith.constant 0 : index
    %c0_13 = arith.constant 0 : index
    %c0_14 = arith.constant 0 : index
    %19 = vector.load %arg2[%c0_12, %c0_13, %c0_14] : memref<1x8x1xf32, #tpu.memory_space<vmem>>, vector<1x8x1xf32>
    %20 = vector.shape_cast %19 : vector<1x8x1xf32> to vector<8x1xf32>
    %cst_15 = arith.constant 0.000000e+00 : f32
    %21 = vector.broadcast %cst_15 : f32 to vector<8x1xf32>
    %22 = arith.cmpf ogt, %20, %21 : vector<8x1xf32>
    %cst_16 = arith.constant -1.000000e+09 : f32
    %23 = vector.shape_cast %22 : vector<8x1xi1> to vector<1x8x1xi1>
    %24 = vector.broadcast %23 : vector<1x8x1xi1> to vector<4x8x8xi1>
    %25 = vector.broadcast %cst_16 : f32 to vector<4x8x8xf32>
    %26 = arith.select %24, %25, %18 : vector<4x8x8xi1>, vector<4x8x8xf32>
    %cst_17 = arith.constant dense<0xFF800000> : vector<4x8xf32>
    %27 = vector.multi_reduction <maximumf>, %26, %cst_17 [2] : vector<4x8x8xf32> to vector<4x8xf32>
    %28 = vector.shape_cast %27 : vector<4x8xf32> to vector<4x8x1xf32>
    %29 = vector.broadcast %28 : vector<4x8x1xf32> to vector<4x8x8xf32>
    %30 = arith.subf %26, %29 : vector<4x8x8xf32>
    %31 = math.exp %30 : vector<4x8x8xf32>
    %cst_18 = arith.constant dense<0.000000e+00> : vector<4x8xf32>
    %32 = vector.multi_reduction <add>, %31, %cst_18 [2] : vector<4x8x8xf32> to vector<4x8xf32>
    %33 = vector.shape_cast %32 : vector<4x8xf32> to vector<4x8x1xf32>
    %34 = tpu.reciprocal %33 {approx = true} : vector<4x8x1xf32> -> vector<4x8x1xf32>
    %35 = vector.broadcast %34 : vector<4x8x1xf32> to vector<4x8x8xf32>
    %36 = arith.mulf %31, %35 : vector<4x8x8xf32>
    %37 = arith.truncf %36 : vector<4x8x8xf32> to vector<4x8x8xbf16>
    %cst_19 = arith.constant dense<0.000000e+00> : vector<4x8x8xf32>
    %38 = tpu.matmul %37, %17, %cst_19 {dimension_numbers = #tpu.dot_dimension_numbers<[2], [0], [1], [2], [0, 0, 0, 1, 1, 2], [0], [1]>} : vector<4x8x8xbf16>, vector<8x4x8xbf16>, vector<4x8x8xf32> -> vector<4x8x8xf32>
    %39 = arith.truncf %38 : vector<4x8x8xf32> to vector<4x8x8xbf16>
    %c0_20 = arith.constant 0 : index
    %c0_21 = arith.constant 0 : index
    %c0_22 = arith.constant 0 : index
    %40 = vector.load %arg12[%c0_20, %c0_21, %c0_22] : memref<4x8x32xbf16, #tpu.memory_space<vmem>>, vector<4x8x32xbf16>
    %cst_23 = arith.constant dense<0.000000e+00> : vector<4x8x32xf32>
    %41 = tpu.matmul %39, %40, %cst_23 {dimension_numbers = #tpu.dot_dimension_numbers<[2], [1], [1], [2], [0, 0, 0, 1, 1, 2], [0], [0]>} : vector<4x8x8xbf16>, vector<4x8x32xbf16>, vector<4x8x32xf32> -> vector<4x8x32xf32>
    %cst_24 = arith.constant dense<0.000000e+00> : vector<8x32xf32>
    %42 = vector.multi_reduction <add>, %41, %cst_24 [0] : vector<4x8x32xf32> to vector<8x32xf32>
    %c0_25 = arith.constant 0 : index
    %c0_26 = arith.constant 0 : index
    %43 = vector.load %arg13[%c0_25, %c0_26] : memref<1x32xf32, #tpu.memory_space<vmem>>, vector<1x32xf32>
    %44 = vector.shape_cast %43 : vector<1x32xf32> to vector<32xf32>
    %45 = vector.shape_cast %44 : vector<32xf32> to vector<1x32xf32>
    %46 = vector.broadcast %45 : vector<1x32xf32> to vector<8x32xf32>
    %47 = arith.addf %42, %46 : vector<8x32xf32>
    %c0_27 = arith.constant 0 : index
    %c0_28 = arith.constant 0 : index
    %c0_29 = arith.constant 0 : index
    %48 = vector.load %arg14[%c0_27, %c0_28, %c0_29] : memref<1x8x32xf32, #tpu.memory_space<vmem>>, vector<1x8x32xf32>
    %49 = vector.shape_cast %48 : vector<1x8x32xf32> to vector<8x32xf32>
    %50 = vector.shape_cast %47 : vector<8x32xf32> to vector<1x8x32xf32>
    tpu.vector_store %arg14[%c0_27, %c0_28, %c0_29], %50 {strides = array<i32>} : memref<1x8x32xf32, #tpu.memory_space<vmem>>, vector<1x8x32xf32>,
    return
  }
  func.func @transform_0(%arg0: i32, %arg1: i32) -> (i32, i32, i32) {
    %c0_i32 = arith.constant 0 : i32
    %c0_i32_0 = arith.constant 0 : i32
    return %arg0, %arg1, %c0_i32 : i32, i32, i32
  }
  func.func @transform_1(%arg0: i32, %arg1: i32) -> (i32, i32, i32) {
    %c0_i32 = arith.constant 0 : i32
    %c0_i32_0 = arith.constant 0 : i32
    return %arg0, %arg1, %c0_i32 : i32, i32, i32
  }
  func.func @transform_2(%arg0: i32, %arg1: i32) -> (i32, i32, i32) {
    %c0_i32 = arith.constant 0 : i32
    %c0_i32_0 = arith.constant 0 : i32
    %c0_i32_1 = arith.constant 0 : i32
    return %arg0, %c0_i32, %c0_i32_0 : i32, i32, i32
  }
  func.func @transform_3(%arg0: i32, %arg1: i32) -> (i32, i32, i32) {
    %c0_i32 = arith.constant 0 : i32
    %c0_i32_0 = arith.constant 0 : i32
    %c0_i32_1 = arith.constant 0 : i32
    return %arg0, %c0_i32, %c0_i32_0 : i32, i32, i32
  }
  func.func @transform_4(%arg0: i32, %arg1: i32) -> (i32, i32) {
    %c0_i32 = arith.constant 0 : i32
    %c0_i32_0 = arith.constant 0 : i32
    %c0_i32_1 = arith.constant 0 : i32
    return %c0_i32, %c0_i32_0 : i32, i32
  }
  func.func @transform_5(%arg0: i32, %arg1: i32) -> (i32, i32) {
    %c0_i32 = arith.constant 0 : i32
    %c0_i32_0 = arith.constant 0 : i32
    %c0_i32_1 = arith.constant 0 : i32
    return %c0_i32, %c0_i32_0 : i32, i32
  }
  func.func @transform_6(%arg0: i32, %arg1: i32) -> (i32, i32) {
    %c0_i32 = arith.constant 0 : i32
    %c0_i32_0 = arith.constant 0 : i32
    %c0_i32_1 = arith.constant 0 : i32
    return %c0_i32, %c0_i32_0 : i32, i32
  }
  func.func @transform_7(%arg0: i32, %arg1: i32) -> (i32, i32) {
    %c0_i32 = arith.constant 0 : i32
    %c0_i32_0 = arith.constant 0 : i32
    %c0_i32_1 = arith.constant 0 : i32
    return %c0_i32, %c0_i32_0 : i32, i32
  }
  func.func @transform_8(%arg0: i32, %arg1: i32) -> (i32, i32) {
    %c0_i32 = arith.constant 0 : i32
    %c0_i32_0 = arith.constant 0 : i32
    %c0_i32_1 = arith.constant 0 : i32
    return %c0_i32, %c0_i32_0 : i32, i32
  }
  func.func @transform_9(%arg0: i32, %arg1: i32) -> (i32, i32) {
    %c0_i32 = arith.constant 0 : i32
    %c0_i32_0 = arith.constant 0 : i32
    %c0_i32_1 = arith.constant 0 : i32
    return %c0_i32, %c0_i32_0 : i32, i32
  }
  func.func @transform_10(%arg0: i32, %arg1: i32) -> (i32, i32, i32) {
    %c0_i32 = arith.constant 0 : i32
    %c0_i32_0 = arith.constant 0 : i32
    %c0_i32_1 = arith.constant 0 : i32
    %c0_i32_2 = arith.constant 0 : i32
    return %c0_i32, %c0_i32_0, %c0_i32_1 : i32, i32, i32
  }
  func.func @transform_11(%arg0: i32, %arg1: i32) -> (i32, i32) {
    %c0_i32 = arith.constant 0 : i32
    %c0_i32_0 = arith.constant 0 : i32
    %c0_i32_1 = arith.constant 0 : i32
    return %c0_i32, %c0_i32_0 : i32, i32
  }
  func.func @transform_12(%arg0: i32, %arg1: i32) -> (i32, i32, i32) {
    %c0_i32 = arith.constant 0 : i32
    %c0_i32_0 = arith.constant 0 : i32
    return %arg0, %arg1, %c0_i32 : i32, i32, i32
  }
}

</mosaic_0001>

<bundles_post_ra>
// kernel: tpu_custom_call.1
= control target key start
LH: loop header
LB: loop body
LE: loop exit
PB: predicated region body
PF: predicated region fallthrough
CT: control target
= control target key end

     0   :  { %s2966_s0 = inlined_call_operand.vmem [shape: f32[2,8,1], index: 0, kind: input, shape index: {}]   ;;  %s2967_s1 = inlined_call_operand.hbm [shape: bf16[2,8,32], index: 1, kind: input, shape index: {}]   ;;  %s2968_s2 = inlined_call_operand.hbm [shape: bf16[2,8,32], index: 2, kind: input, shape index: {}]   ;;  %s2969_s3 = inlined_call_operand.hbm [shape: bf16[2,8,32], index: 3, kind: input, shape index: {}]   ;;  %s2970_s4 = inlined_call_operand.vmem [shape: bf16[32,32], index: 4, kind: input, shape index: {}]   ;;  %s2971_s5 = inlined_call_operand.hbm [shape: f32[1,32], index: 5, kind: input, shape index: {}]   ;;  %s2972_s6 = inlined_call_operand.hbm [shape: bf16[32,32], index: 6, kind: input, shape index: {}]   ;;  %s2973_s7 = inlined_call_operand.hbm [shape: f32[1,32], index: 7, kind: input, shape index: {}]   ;;  %s2974_s8 = inlined_call_operand.vmem [shape: bf16[32,32], index: 8, kind: input, shape index: {}]   ;;  %s2975_s9 = inlined_call_operand.vmem [shape: f32[1,32], index: 9, kind: input, shape index: {}]   ;;  %s2976_s10 = inlined_call_operand.hbm [shape: bf16[4,8,32], index: 10, kind: input, shape index: {}]   ;;  %s2977_s11 = inlined_call_operand.vmem [shape: f32[1,32], index: 11, kind: input, shape index: {}]   ;;  %s2978_s12 = inlined_call_operand.hbm [shape: f32[2,8,32], index: 12, kind: output, shape index: {}]  }
   0x1   :  { %2995 = sst [smem:[#allocation29_spill]] %s2968_s2 }
   0x2   :  { %2996 = sst [smem:[#allocation30_spill]] %s2971_s5 }
   0x3   :  { %2997 = sst [smem:[#allocation31_spill]] %s2972_s6 }
   0x4   :  { %2998 = sst [smem:[#allocation32_spill]] %s2973_s7 }
   0x5   :  { %2999 = sst [smem:[#allocation33_spill]] %s2977_s11 }
   0x6   :  { %3000 = sst [smem:[#allocation34_spill]] %s2978_s12 }
   0x7   :  { %17 = vsyncpa [#allocation5], 0 }
   0x8   :  { %19 = vsyncpa [#allocation5 + $0x1], 0 }
   0x9   :  { %20 = vsyncpa [#allocation8], 0 }
   0xa   :  { %22 = vsyncpa [#allocation8 + $0x1], 0 }
   0xb   :  { %23 = vsyncpa [#allocation11], 0 }
   0xc   :  { %24 = vsyncpa [#allocation14], 0 }
   0xd   :  { %25 = vsyncpa [#allocation6], 0 }
   0xe   :  { %27 = vsyncpa [#allocation6 + $0x1], 0  ;;  %s2569_s21 = smov 0   ;;  %s2571_s22 = smov 0  }
   0xf   :  { %s2573_s23 = smov 0   ;;  %s2575_s24 = smov 0  }
  0x10   :  { %s2577_s25 = smov 0   ;;  %s2579_s26 = smov 0  }
  0x11 LB: > { %3001 = sst [smem:[#allocation22_spill]] %s2464_s21  ;;  %s2600_s27 = sadd.s32 4294967295, %s2484_s26   ;;  %s2484_s26 = sphi %s2579_s26, %s33_s26   ;;  %s2480_s25 = sphi %s2577_s25, %s3043_s25   ;;  %s2476_s24 = sphi %s2575_s24, %s3042_s24   ;;  %s2472_s23 = sphi %s2573_s23, %s3046_s23   ;;  %s2468_s22 = sphi %s2571_s22, %s3045_s22   ;;  %s2464_s21 = sphi %s2569_s21, %s3044_s21  }
  0x12   : > { %3002 = sst [smem:[#allocation23_spill]] %s2480_s25  ;;  %p1873_p0 = scmp.ge.s32.totalorder %s2484_s26, 1 }
  0x13   : > { %3003 = sst [smem:[#allocation24_spill]] %s2484_s26  ;;  %p2979_p1 = scmp.eq.s32.totalorder %s2600_s27, 0 }
  0x14   : > { %p354_p2 = scmp.lt.s32.totalorder %s2484_s26, 3  ;;  %s2486_s29 = smov [#allocation10]  }
  0x15   : > { %s370_s30 = sshll.u32 %s2486_s29, 4  ;;  %s2487_s13 = smov [#allocation13]   ;;  %s371_s30 = int_to_ptr.vmem [resolvable:$true] %s370_s30 }
  0x16   : > { %p2605_p3 = pnand %p1873_p0, %p354_p2  ;;  %s394_s14 = sshll.u32 %s2487_s13, 4  ;;  %s395_s14 = int_to_ptr.vmem [resolvable:$true] %s394_s14 }
  0x17   : > { %s2215_s16 = scalar_lea.vmem %s371_s30, 16  ;;  %s2222_s17 = scalar_lea.vmem %s371_s30, 32 }
  0x18   : > { %s3004_s28 = scalar_select %p2605_p3, 1, 0 }
  0x19   : > { %p2081_p5 = pneg %p2605_p3  ;;  %p2216_p8 = scmp.ne.s32.totalorder %s371_s30, %s2215_s16 }
  0x1a   : > { %p2223_p11 = scmp.lt.s32.totalorder %s371_s30, %s371_s30  ;;  %p2224_p12 = scmp.lt.s32.totalorder %s2222_s17, %s2215_s16 }
  0x1b   : > { %p2614_p6 = pnand %p2081_p5, %p2979_p1 }
  0x1c   : > { %p2225_p13 = por %p2224_p12, %p2223_p11 }
  0x1d   : > { %p2990_p7 = pneg %p2614_p6 }
  0x1f   : > { %p2218_p9 = pnand %p2216_p8, %p2990_p7 }
  0x21   : > { %p2219_p10 = pneg %p2218_p9 }
  0x23   : > { %p2226_p0 = pnand %p2225_p13, %p2219_p10 }
  0x25   : > { %2229 = shalt.err (!%p2226_p0)
}
  0x26   : > { %s3006_s5 = sld [smem:[#allocation30_spill]]  ;;  %s2241_s20 = scalar_lea.vmem %s395_s14, 16 }
  0x27   : > { %p2242_p2 = scmp.ne.s32.totalorder %s395_s14, %s2241_s20  ;;  %s2248_s29 = scalar_lea.vmem %s395_s14, 32 }
  0x28   : > { %p2249_p9 = scmp.lt.s32.totalorder %s395_s14, %s395_s14  ;;  %p2250_p4 = scmp.lt.s32.totalorder %s2248_s29, %s2241_s20 }
  0x29   : > { %p2244_p5 = pnand %p2242_p2, %p2990_p7 }
  0x2a   : > { %p2251_p1 = por %p2250_p4, %p2249_p9 }
  0x2b   : > { %p2245_p8 = pneg %p2244_p5 }
  0x2c   : > { %2084 = dma.hbm_to_vmem [thread:$0]  (!%p2614_p6), %s3006_s5, 16, %s371_s30, [#allocation11]  }
  0x2d   : > { %p2252_p11 = pnand %p2251_p1, %p2245_p8 }
  0x2f   : > { %2255 = shalt.err (!%p2252_p11)
}
  0x30   : > { %s3007_s7 = sld [smem:[#allocation32_spill]]  ;;  %s1872_s30 = sadd.s32 4294967294, %s2484_s26  }
  0x31   : > { %s45_s17 = sadd.s32 1, %s2480_s25  ;;  %s82_s18 = sadd.s32 1, %s2472_s23 }
  0x32   : > { %p47_p1 = scmp.ge.s32.totalorder %s45_s17, 2  ;;  %p89_p4 = scmp.ne.s32.totalorder %s2472_s23, %s2468_s22 }
  0x33   : > { %p90_p10 = scmp.eq.s32.totalorder %s2484_s26, 0  ;;  %p95_p13 = scmp.ne.s32.totalorder %s2468_s22, %s2464_s21 }
  0x34   : > { %s3048_s17 = smov (%p47_p1, %s45_s17), 0  ;;  %p341_p0 = scmp.eq.s32.totalorder %s2600_s27, 1 }
  0x35   : > { %3008 = sst [smem:[#allocation25_spill]] %s3048_s17  ;;  %p2644_p12 = por %p90_p10, %p89_p4 }
  0x36   : > { %2090 = dma.hbm_to_vmem [thread:$0]  (!%p2614_p6), %s3007_s7, 16, %s395_s14, [#allocation14]  }
  0x37   : > { %s77_s14 = ssub.s32 %s2480_s25, %s3048_s17  ;;  %p3010_p5 = scmp.eq.s32.totalorder %s2600_s27, 0 }
  0x38   : > { %p80_p2 = scmp.eq.s32.totalorder %s77_s14, 0  ;;  %p2659_p9 = por %p341_p0, %p89_p4 }
  0x39   : > { %p2655_p8 = por %p3010_p5, %p95_p13  ;;  %p347_p11 = scmp.eq.s32.totalorder %s1872_s30, 1 }
  0x3a   : > { %s3012_s29 = scalar_select %p2659_p9, 1, 0 }
  0x3b   : > { %s3011_s20 = scalar_select %p2655_p8, 1, 0 }
  0x3c   : > { %3013 = sst [smem:[#allocation26_spill]] %s3012_s29  ;;  %p2666_p1 = por %p347_p11, %p95_p13 }
  0x3d   : > { %s2664_s13 = scalar_select %p80_p2, %s2472_s23, %s82_s18  }
  0x3e   : > { %s3015_s16 = scalar_select %p2666_p1, 1, 0 }
  0x3f   : > { %3014 = sst [smem:[#allocation27_spill]] %s2664_s13  ;;  %p2112_p10 = scmp.lt.s32.totalorder %s2484_s26, 2 }
  0x40   : > { %3016 = sst [smem:[#allocation28_spill]] %s3015_s16  ;;  %s2985_s5 = sand.u32 1, %s2472_s23  }
  0x41   : > { %s2673_s7 = sshll.u32 %s2480_s25, 6  ;;  %s2677_s14 = sshll.u32 %s2985_s5, 2 }
  0x42   : > { %p2681_p4 = pnand %p2112_p10, %p2644_p12  ;;  %s456_s30 = sand.u32 1, %s2484_s26  }
  0x43   : > { %s3018_s2 = sld [smem:[#allocation29_spill]]  ;;  %s460_s21 = scalar_lea.vmem [#allocation7], %s2677_s14 }
  0x44   : > { %s467_s25 = sshll.u32 %s460_s21, 4  ;;  %s2691_s12 = scalar_lea.sflag [#allocation8], %s456_s30  ;;  %s468_s25 = int_to_ptr.vmem [resolvable:$true] %s467_s25 }
  0x45   : > { %p2991_p13 = pneg %p2681_p4  ;;  %s2269_s19 = scalar_lea.vmem %s468_s25, 64 }
  0x46   : > { %p2270_p0 = scmp.ne.s32.totalorder %s468_s25, %s2269_s19  ;;  %s2488_s5 = smov [#allocation7]  }
  0x47   : > { %s2274_s29 = sshll.u32 %s2488_s5, 4  ;;  %s2275_s29 = int_to_ptr.vmem [resolvable:$false] %s2274_s29 }
  0x48   : > { %p2272_p12 = pnand %p2270_p0, %p2991_p13  ;;  %s2276_s26 = scalar_lea.vmem %s2275_s29, 128 }
  0x49   : > { %s465_s16 = scalar_lea.hbm %s3018_s2, %s2673_s7  ;;  %p2277_p5 = scmp.lt.s32.totalorder %s468_s25, %s2275_s29 }
  0x4a   : > { %p2273_p2 = pneg %p2272_p12  ;;  %p2278_p11 = scmp.lt.s32.totalorder %s2276_s26, %s2269_s19 }
  0x4c   : > { %p2279_p10 = por %p2278_p11, %p2277_p5 }
  0x4e   : > { %p2280_p7 = pnand %p2279_p10, %p2273_p2 }
  0x50   : > { %2283 = shalt.err (!%p2280_p7)
}
  0x51   : > { %2100 = dma.hbm_to_vmem [thread:$0]  (!%p2681_p4), %s465_s16, 64, %s468_s25, %s2691_s12  }
  0x52   : > { %s2489_s21 = smov [#allocation12]   ;;  %p3019_p12 = pneg %p2614_p6 }
  0x53   : > { %s380_s13 = sshll.u32 %s2489_s21, 4  ;;  %s381_s13 = int_to_ptr.vmem [resolvable:$true] %s380_s13 }
  0x54   : > { %s2295_s30 = scalar_lea.vmem %s381_s13, 256  ;;  %p2303_p9 = scmp.lt.s32.totalorder %s381_s13, %s381_s13 }
  0x55   : > { %p2296_p0 = scmp.ne.s32.totalorder %s381_s13, %s2295_s30  ;;  %p2304_p8 = scmp.lt.s32.totalorder %s2295_s30, %s2295_s30 }
  0x57   : > { %p2298_p13 = pnand %p2296_p0, %p3019_p12  ;;  %p2305_p3 = por %p2304_p8, %p2303_p9 }
  0x59   : > { %p2299_p1 = pneg %p2298_p13 }
  0x5b   : > { %p2306_p5 = pnand %p2305_p3, %p2299_p1 }
  0x5d   : > { %2309 = shalt.err (!%p2306_p5)
}
  0x5e   : > { %s2490_s5 = smov 64   ;;  %s2491_s26 = smov 4  }
  0x5f   : > { %s3020_s6 = sld [smem:[#allocation31_spill]]  ;;  %s2492_s16 = smov [#allocation15]  }
  0x60   : > { %s410_s18 = sshll.u32 %s2492_s16, 4  ;;  %p3021_p7 = pmov %p3019_p12  ;;  %s411_s18 = int_to_ptr.vmem [resolvable:$true] %s410_s18 }
  0x61   : > { %s2321_s2 = scalar_lea.vmem %s411_s18, 256  ;;  %p2329_p1 = scmp.lt.s32.totalorder %s411_s18, %s411_s18 }
  0x62   : > { %p2322_p3 = scmp.ne.s32.totalorder %s411_s18, %s2321_s2  ;;  %p2330_p13 = scmp.lt.s32.totalorder %s2321_s2, %s2321_s2 }
  0x64   : > { %p2324_p8 = pnand %p2322_p3, %p3021_p7  ;;  %p2331_p2 = por %p2330_p13, %p2329_p1 }
  0x65   : > { %2087 = dma.hbm_to_vmem [thread:$0]  (!%p2614_p6), %s3020_s6, 256, %s381_s13, [#allocation11], %s2490_s5, %s2490_s5, %s2491_s26  }
  0x66   : > { %p2325_p9 = pneg %p2324_p8 }
  0x68   : > { %p2332_p11 = pnand %p2331_p2, %p2325_p9 }
  0x6a   : > { %2335 = shalt.err (!%p2332_p11)
}
  0x6b   : > { %2093 = dma.hbm_to_vmem [thread:$0]  (!%p2614_p6), %s2976_s10, 256, %s411_s18, [#allocation14], %s2490_s5, %s2490_s5, %s2491_s26  }
  0x6c   : > { %s441_s29 = scalar_lea.vmem [#allocation4], %s2677_s14  ;;  %s483_s2 = scalar_lea.hbm %s2969_s3, %s2673_s7 }
  0x6d   : > { %s449_s16 = sshll.u32 %s441_s29, 4  ;;  %s3022_s30 = sand.u32 1, %s2472_s23   ;;  %s450_s16 = int_to_ptr.vmem [resolvable:$true] %s449_s16 }
  0x6e   : > { %s438_s6 = scalar_lea.sflag [#allocation5], %s3022_s30  ;;  %s2349_s11 = scalar_lea.vmem %s450_s16, 64 }
  0x6f   : > { %p2350_p10 = scmp.ne.s32.totalorder %s450_s16, %s2349_s11  ;;  %p3023_p0 = pneg %p2681_p4 }
  0x70   : > { %s2493_s15 = smov [#allocation4]  }
  0x71   : > { %p2352_p12 = pnand %p2350_p10, %p3023_p0  ;;  %s2354_s13 = sshll.u32 %s2493_s15, 4  ;;  %s2355_s13 = int_to_ptr.vmem [resolvable:$false] %s2354_s13 }
  0x72   : > { %s2356_s25 = scalar_lea.vmem %s2355_s13, 128  ;;  %p2357_p6 = scmp.lt.s32.totalorder %s450_s16, %s2355_s13 }
  0x73   : > { %p2353_p5 = pneg %p2352_p12  ;;  %p2358_p3 = scmp.lt.s32.totalorder %s2356_s25, %s2349_s11 }
  0x75   : > { %p2359_p7 = por %p2358_p3, %p2357_p6 }
  0x77   : > { %p2360_p8 = pnand %p2359_p7, %p2353_p5 }
  0x79   : > { %2363 = shalt.err (!%p2360_p8)
}
  0x7a   : > { %s3024_s18 = scalar_lea.hbm %s2967_s1, %s2673_s7  ;;  %s478_s30 = scalar_lea.vmem [#allocation9], %s2677_s14 }
  0x7b   : > { %2097 = dma.hbm_to_vmem [thread:$0]  (!%p2681_p4), %s3024_s18, 64, %s450_s16, %s438_s6  }
  0x7c   : > { %s485_s29 = sshll.u32 %s478_s30, 4  ;;  %p3025_p1 = pmov %p3023_p0  ;;  %s486_s29 = int_to_ptr.vmem [resolvable:$true] %s485_s29 }
  0x7d   : > { %s2377_s19 = scalar_lea.vmem %s486_s29, 64  ;;  %s2494_s11 = smov [#allocation9]  }
  0x7e   : > { %p2378_p9 = scmp.ne.s32.totalorder %s486_s29, %s2377_s19  ;;  %s2382_s21 = sshll.u32 %s2494_s11, 4  ;;  %s2383_s21 = int_to_ptr.vmem [resolvable:$false] %s2382_s21 }
  0x7f   : > { %s2384_s15 = scalar_lea.vmem %s2383_s21, 128  ;;  %p2385_p11 = scmp.lt.s32.totalorder %s486_s29, %s2383_s21 }
  0x80   : > { %p2380_p13 = pnand %p2378_p9, %p3025_p1  ;;  %p2386_p10 = scmp.lt.s32.totalorder %s2384_s15, %s2377_s19 }
  0x82   : > { %p2381_p2 = pneg %p2380_p13  ;;  %p2387_p0 = por %p2386_p10, %p2385_p11 }
  0x84   : > { %p2388_p12 = pnand %p2387_p0, %p2381_p2 }
  0x86   : > { %2391 = shalt.err (!%p2388_p12)
}
  0x87   : > { %2103 = dma.hbm_to_vmem [thread:$0]  (!%p2681_p4), %s483_s2, 64, %s486_s29, %s2691_s12  }
  0x88   : > { %p3026_p5 = scmp.ne.s32.totalorder %s3004_s28, 0 }
  0x89   : > { %s2753_s16 = sand.u32 (!%p3026_p5), 1, %s2468_s22   ;;  %p3027_p6 = scmp.ne.s32.totalorder (!%p3026_p5), %s3011_s20, 0 }
  0x8a   : > { %494 = sbr.rel (%p3026_p5) target bundleno = 1509 (0x5e5), region = 68  ;;  %s2756_s13 = sshll.u32 (!%p3026_p5), %s2753_s16, 2 }
  0x8b   : > { %s497_s17 = scalar_lea.sflag (!%p3026_p5), [#allocation5], %s2753_s16  ;;  %s500_s25 = scalar_lea.vmem (!%p3026_p5), [#allocation4], %s2756_s13 }
  0x8f   : > { %2443 = dma.done.wait (%p3027_p6), %s497_s17, 64  }
  0x90   : > { %2445 = vsyncadd (%p3027_p6), %s497_s17, 4294967232  ;;  %s505_s7 = sand.u32 1, %s2600_s27   ;;  %s509_s28 = scalar_lea.vmem [#allocation7], %s2756_s13 }
  0x91   : > { %s506_s12 = scalar_lea.sflag [#allocation8], %s505_s7 }
  0x92   : > { %2447 = dma.done.wait (%p3027_p6), %s506_s12, 128  }
  0x93   : > { %2449 = vsyncadd (%p3027_p6), %s506_s12, 4294967168  ;;  %s518_s2 = scalar_lea.vmem [#allocation9], %s2756_s13  ;;  %p3028_p4 = scmp.eq.s32.totalorder %s2600_s27, 0 }
  0x95   : > { %2451 = dma.done.wait (%p3028_p4), [#allocation11], 272   ;;  %p3029_p3 = pmov %p3028_p4 }
  0x97   : > { %2453 = vsyncadd (%p3029_p3), [#allocation11], 4294967024  ;;  %p3030_p7 = pmov %p3029_p3 }
  0x98   : > { %p3031_p8 = pmov %p3029_p3 }
  0x99   : > { %2455 = dma.done.wait (%p3030_p7), [#allocation14], 272  }
  0x9a   : > { %2457 = vsyncadd (%p3031_p8), [#allocation14], 4294967024  ;;  %v2495_v0 = vmov 0.0   ;;  %vm2496_vm0 = vmmov 0   ;;  %v2182_v1 = vld [vmem:[#allocation12 + $0x8] sm:$0xff]   ;;  %v2183_v2 = vld [vmem:[#allocation12] sm:$0xff]   ;;  %v827_v27 = vlaneseq }
  0x9b   : > { %1961 = vmatprep.subr.bf16.mxu0 %v2495_v0  ;;  %1965 = vmatprep.mubr.msk.bf16.mxu0 %vm2496_vm0, %v2495_v0  ;;  %v604_v3 = vld [vmem:[%s509_s28] sm:$0xf]  ;;  %vm629_vm1 = vcmask 261120   ;;  %v2184_v4 = vld [vmem:[%s2970_s4 + $0x8] sm:$0xff]   ;;  %v744_v6 = vld [vmem:[%s500_s25] sm:$0xf] }
  0x9c   : > { %1969 = vmatprep.subr.bf16.mxu1 %v2495_v0  ;;  %1973 = vmatprep.mubr.msk.bf16.mxu1 %vm2496_vm0, %v2495_v0  ;;  %v2185_v5 = vld [vmem:[%s2970_s4] sm:$0xff]   ;;  %vm740_vm2 = vcmask 257024   ;;  %v1903_v15 = vld [vmem:[#allocation10] ss:$0 sm:$0xff]  ;;  %v2186_v19 = vld [vmem:[%s2974_s8 + $0x8] sm:$0xff]   ;;  %s2497_s29 = smov 104  }
  0x9d   : > { %1962 = vmatpush3.bf16.msra.mxu0 %v2182_v1  ;;  %v1895_v7 = vld [vmem:[#allocation13] ss:$0 sm:$0xff]  ;;  %s2498_s19 = smov 120   ;;  %1970 = vmatpush3.bf16.msra.mxu1 %v2186_v19  ;;  %s2499_s15 = smov 112   ;;  %v605_v23 = vld [vmem:[%s518_s2] sm:$0xf] }
  0x9e   : > { %1963 = vmatprep.subr.bf16.mxu0 %v2495_v0  ;;  %1971 = vmatprep.subr.bf16.mxu1 %v2495_v0  ;;  %v2187_v22 = vld [vmem:[%s2974_s8] sm:$0xff]   ;;  %p592_p9 = scmp.lt.s32.totalorder %s2476_s24, 1  ;;  %v2500_v25 = vmov 1983009808   ;;  %v2501_v30 = vmov 1934713408  }
  0x9f   : > { %v825_v26 = vunpack.c.l.s4 %v2500_v25  ;;  %v857_v31 = vunpack.c.l.s4 %v2501_v30  ;;  %v828_v33 = vshrl.u32 %v827_v27, 7  ;;  %v2502_v34 = vmov 0   ;;  %s1893_s28 = sshll.u32 %s2753_s16, 3  ;;  %s3032_s20 = sld [smem:[#allocation33_spill]] }
  0xa0   : > { %s593_s6 = scalar_select %p592_p9, %s2476_s24, 1  ;;  %vm1047_vm4 = vcmask 1043456   ;;  %vm1043_vm5 = vcmask 64512  }
  0xa1   : > { %1964 = vmatpush3.bf16.msra.mxu0 %v2183_v2  ;;  %1972 = vmatpush3.bf16.msra.mxu1 %v2187_v22  ;;  %v826_v32 = vunpack.c.0.s8 %v825_v26  ;;  %v858_v38 = vunpack.c.0.s8 %v857_v31  ;;  %s3033_s5 = sld [smem:[#allocation26_spill]]  ;;  %s1925_s26 = sshll.u32 %s2476_s24, 7 }
  0xa2   : > { %1977 = vmatprep.subr.bf16.mxu0 %v2495_v0  ;;  %1985 = vmatprep.subr.bf16.mxu1 %v2495_v0  ;;  %s1894_s14 = sshll.u32 %s593_s6, 3  ;;  %s591_s18 = scalar_lea.vmem [#allocation16], %s1893_s28 }
  0xa3   : > { %s598_s7 = scalar_lea.vmem %s2966_s0, %s1894_s14  ;;  %v829_v39 = vsub.s32 %v826_v32, %v828_v33  ;;  %v861_v46 = vsub.s32 %v858_v38, %v828_v33  ;;  %s1695_s30 = sshll.u32 %s591_s18, 4  ;;  %s1696_s30 = int_to_ptr.vmem [resolvable:$true] %s1695_s30 }
  0xa4   : > { %1966 = vmatmul.mubr.msk.bf16.vlgmr.msra.gmra.mxu0 %vm629_vm1, %v604_v3  ;;  %1974 = vmatmul.mubr.msk.bf16.vlgmr.msra.gmra.mxu1 %vm629_vm1, %v605_v23  ;;  %v1229_v24 = vld [vmem:[%s598_s7] sm:$0xff]  ;;  %s3034_s11 = sld [smem:[#allocation34_spill]]  ;;  %s2392_s6 = scalar_lea.vmem %s1696_s30, 128 }
  0xa5   : > { %1978 = vmatpush3.bf16.msra.mxu0 %v2184_v4  ;;  %1981 = vmatprep.mubr.msk.bf16.mxu0 %vm2496_vm0, %v2495_v0  ;;  %vm1230_vm3 = vcmp.gt.f32.partialorder %v1229_v24, 0.0  ;;  %v1899_v24 = vld [vmem:[%s2975_s9] ss:$0 sm:$0xff]  ;;  %p2393_p1 = scmp.ne.s32.totalorder %s1696_s30, %s2392_s6  ;;  %s2503_s24 = smov [#allocation16]  }
  0xa6   : > { %1979 = vmatprep.subr.bf16.mxu0 %v2495_v0  ;;  %1987 = vmatprep.mubr.msk.bf16.mxu1 %vm2496_vm0, %v2495_v0  ;;  %v1231_v35 = vsel %vm1230_vm3, 1, %v2502_v34  ;;  %s2396_s14 = sshll.u32 %s2503_s24, 4  ;;  %s2397_s14 = int_to_ptr.vmem [resolvable:$false] %s2396_s14 }
  0xa7   : > { %p3035_p13 = scmp.ne.s32.totalorder %s3033_s5, 0  ;;  %s2398_s17 = scalar_lea.vmem %s2397_s14, 256 }
  0xa8   : > { %p2399_p10 = scmp.lt.s32.totalorder %s1696_s30, %s2397_s14  ;;  %p2400_p0 = scmp.lt.s32.totalorder %s2398_s17, %s2392_s6 }
  0xa9   : > { %1980 = vmatpush3.bf16.msra.mxu0 %v2185_v5  ;;  %p2394_p2 = pnand %p2393_p1, %p3035_p13 }
  0xaa   : > { %1991 = vmatprep.subr.bf16.mxu0 %v2495_v0  ;;  %s2923_s21 = scalar_lea.hbm %s3034_s11, %s1925_s26  ;;  %p2401_p12 = por %p2400_p0, %p2399_p10 }
  0xab   : > { %p2395_p11 = pneg %p2394_p2 }
  0xac   : > { %1982 = vmatmul.mubr.msk.bf16.vlgmr.msra.gmra.mxu0 %vm629_vm1, %v744_v6 }
  0xad   : > { %1993 = vmatprep.mubr.msk.bf16.mxu0 %vm2496_vm0, %v2495_v0  ;;  %p2402_p5 = pnand %p2401_p12, %p2395_p11 }
 0x164   : > { %v667_v8 = vpop.f32.mrf.mxu0  ;;  %v733_v25 = vpop.f32.mrf.mxu1 }
 0x165   : > { %v668_v9 = vadd.f32 %v1895_v7, %v667_v8  ;;  %v734_v26 = vadd.f32 %v1899_v24, %v733_v25 }
 0x166   : > { %v1967_v10 = vpop.f32.mrf.mxu0  ;;  %v1975_v27 = vpop.f32.mrf.mxu1 }
 0x167   : > { %v739_v11 = vpack.c.bf16 %v668_v9, %v668_v9 }
 0x168   : > { %v670_v12 = vpop.f32.mrf.mxu0 }
 0x169   : > { %741 = vst.msk [vmem:[#allocation2] sm:$0xf] %vm740_vm2, %v739_v11 }
 0x16a   : > { %v1968_v13 = vpop.f32.mrf.mxu0 }
 0x16c   : > { %v806_v14 = vpop.f32.mrf.mxu0 }
 0x16d   : > { %v807_v20 = vadd.f32 %v1903_v15, %v806_v14 }
 0x16e   : > { %v1983_v16 = vpop.f32.mrf.mxu0 }
 0x170   : > { %v898_v17 = vld [vmem:[#allocation2] sm:$0xf]  ;;  %v809_v18 = vpop.f32.mrf.mxu0 }
 0x171   : > { %906 = vrot.lane.b32.xlu1 %v898_v17, %s2497_s29  ;;  %900 = vrot.lane.b32.xlu0 %v898_v17, %s2498_s19 }
 0x172   : > { %v1984_v21 = vpop.f32.mrf.mxu0 }
 0x175   : > { %903 = vrot.lane.b32.xlu0 %v898_v17, %s2499_s15  ;;  %813 = vrot.lane.b32.xlu1 %v807_v20, %s2498_s19 }
 0x179   : > { %816 = vrot.lane.b32.xlu0 %v807_v20, %s2499_s15  ;;  %819 = vrot.lane.b32.xlu1 %v807_v20, %s2497_s29 }
 0x197   : > { %979 = vxpose.xlu0.c.b16.start.end [1/1] (short) (narrow) %v898_v17, 16 }
 0x1e3   : > { %v907_v28 = vpop.permute.xlu1 %906  ;;  %v901_v29 = vpop.permute.xlu0 %900 }
 0x1e4   : > { %995 = vxpose.xlu1.c.b16.start.end [1/1] (short) (narrow) %v901_v29, 16  ;;  %v736_v29 = vpop.f32.mrf.mxu1 }
 0x1e6   : > { %v1976_v30 = vpop.f32.mrf.mxu1 }
 0x1e7   : > { %v904_v36 = vpop.permute.xlu0 %903  ;;  %v814_v37 = vpop.permute.xlu1 %813 }
 0x1e8   : > { %1011 = vxpose.xlu0.c.b16.start.end [1/1] (short) (narrow) %v904_v36, 16  ;;  %2180 = vset.pattern.permute.xlu1 %v2502_v34 }
 0x1e9   : > { %1233 = vperm.xlu1 %2180, %v1231_v35  }
 0x1eb   : > { %v817_v40 = vpop.permute.xlu0 %816  ;;  %v820_v41 = vpop.permute.xlu1 %819 }
 0x1ec   : > { %v822_v42 = vcombine.low %v807_v20, %v817_v40  ;;  %v823_v43 = vcombine.high %v807_v20, %v817_v40  ;;  %v838_v44 = vcombine.low %v814_v37, %v820_v41  ;;  %v839_v45 = vcombine.high %v814_v37, %v820_v41  ;;  %1027 = vxpose.xlu0.c.b16.start.end [1/1] (short) (narrow) %v907_v28, 16 }
 0x1ed   : > { %v742_v28 = vpack.c.bf16 %v734_v26, %v734_v26 }
 0x1ee   : > { %v830_v47 = vrot.slane %v822_v42, %v829_v39  ;;  %v837_v48 = vrot.slane %v823_v43, %v829_v39  ;;  %v846_v49 = vrot.slane %v838_v44, %v829_v39  ;;  %v853_v50 = vrot.slane %v839_v45, %v829_v39 }
 0x1ef   : > { %743 = vst.msk [vmem:[#allocation3] sm:$0xf] %vm740_vm2, %v742_v28 }
 0x1f0   : > { %v854_v51 = vcombine.low %v830_v47, %v846_v49  ;;  %v855_v52 = vcombine.high %v830_v47, %v846_v49  ;;  %v870_v53 = vcombine.low %v837_v48, %v853_v50  ;;  %v871_v54 = vcombine.high %v837_v48, %v853_v50 }
 0x1f2   : > { %v862_v55 = vrot.slane %v854_v51, %v861_v46  ;;  %v869_v56 = vrot.slane %v855_v52, %v861_v46  ;;  %v878_v57 = vrot.slane %v870_v53, %v861_v46  ;;  %v885_v58 = vrot.slane %v871_v54, %v861_v46 }
 0x1f4   : > { %v886_v59 = vcombine.high %v862_v55, %v2495_v0  ;;  %v887_v60 = vcombine.high %v869_v56, %v2495_v0  ;;  %v888_v61 = vcombine.high %v878_v57, %v2495_v0  ;;  %v889_v62 = vcombine.high %v885_v58, %v2495_v0 }
 0x1f5   : > { %v1907_v63 = vpack.c.bf16 %v878_v57, %v862_v55  ;;  %v1908_v1 = vpack.c.bf16 %v885_v58, %v869_v56  ;;  %2181 = vset.pattern.permute.xlu0 %v2502_v34 }
 0x1f6   : > { %v1909_v2 = vpack.c.bf16 %v888_v61, %v886_v59  ;;  %v1910_v3 = vpack.c.bf16 %v889_v62, %v887_v60  ;;  %v2856_v37 = vld [vmem:[#allocation3] sm:$0xf] }
 0x1f7   : > { %v924_v4 = vrot.slane %v1907_v63, %v829_v39  ;;  %v932_v5 = vrot.slane %v1908_v1, %v829_v39  ;;  %v1292_v38 = vsel %vm1047_vm4, %v2856_v37, 0 }
 0x1f8   : > { %v949_v6 = vrot.slane %v1909_v2, %v829_v39  ;;  %v957_v7 = vrot.slane %v1910_v3, %v829_v39 }
 0x1f9   : > { %v933_v8 = vcombine.low %v924_v4, %v932_v5  ;;  %v987_v9 = vpop.trf.xlu0 }
 0x1fa   : > { %v958_v10 = vcombine.low %v949_v6, %v957_v7  ;;  %v1049_v11 = vsel %vm1047_vm4, %v987_v9, 0 }
 0x1fb   : > { %v940_v12 = vrot.slane %v933_v8, %v861_v46  ;;  %1986 = vmatpush3.bf16.msra.mxu1 %v1049_v11 }
 0x1fc   : > { %v965_v13 = vrot.slane %v958_v10, %v861_v46  ;;  %1997 = vmatprep.subr.bf16.mxu1 %v2495_v0 }
 0x1fd   : > { %v941_v14 = vcombine.high %v940_v12, %v2502_v34  ;;  %v970_v17 = vshrl.u32 %v940_v12, 16 }
 0x1fe   : > { %v969_v15 = vpack.i.b16 %v965_v13, %v940_v12  ;;  %v966_v16 = vcombine.high %v965_v13, %v2502_v34  ;;  %v971_v18 = vshrl.u32 %v965_v13, 16 }
 0x1ff   : > { %v976_v21 = vshrl.u32 %v941_v14, 16 }
 0x200   : > { %1988 = vmatmul.mubr.msk.bf16.vlgmr.msra.gmra.mxu1 %vm1043_vm5, %v969_v15  ;;  %v972_v19 = vpack.i.b16 %v971_v18, %v970_v17  ;;  %v975_v20 = vpack.i.b16 %v966_v16, %v941_v14  ;;  %v977_v22 = vshrl.u32 %v966_v16, 16 }
 0x201   : > { %1999 = vmatprep.mubr.msk.bf16.mxu1 %vm2496_vm0, %v2495_v0 }
 0x202   : > { %v978_v23 = vpack.i.b16 %v977_v22, %v976_v21 }
 0x246   : > { %v1003_v31 = vpop.trf.xlu1 }
 0x247   : > { %v1095_v32 = vsel %vm1047_vm4, %v1003_v31, 0 }
 0x248   : > { %1992 = vmatpush3.bf16.msra.mxu0 %v1095_v32 }
 0x249   : > { %2003 = vmatprep.subr.bf16.mxu0 %v2495_v0 }
 0x24a   : > { %v1019_v33 = vpop.trf.xlu0 }
 0x24b   : > { %v1141_v34 = vsel %vm1047_vm4, %v1019_v33, 0  ;;  %1994 = vmatmul.mubr.msk.bf16.vlgmr.msra.gmra.mxu0 %vm1043_vm5, %v972_v19 }
 0x24c   : > { %1998 = vmatpush3.bf16.msra.mxu1 %v1141_v34  ;;  %2005 = vmatprep.mubr.msk.bf16.mxu0 %vm2496_vm0, %v2495_v0 }
 0x24d   : > { %2009 = vmatprep.subr.bf16.mxu1 %v2495_v0 }
 0x24e   : > { %v1035_v35 = vpop.trf.xlu0 }
 0x24f   : > { %v1187_v36 = vsel %vm1047_vm4, %v1035_v35, 0  ;;  %2000 = vmatmul.mubr.msk.bf16.vlgmr.msra.gmra.mxu1 %vm1043_vm5, %v975_v20 }
 0x250   : > { %2004 = vmatpush3.bf16.msra.mxu0 %v1187_v36  ;;  %2011 = vmatprep.mubr.msk.bf16.mxu1 %vm2496_vm0, %v2495_v0 }
 0x251   : > { %2015 = vmatprep.subr.bf16.mxu0 %v2495_v0  ;;  %2010 = vmatpush3.bf16.msra.mxu1 %v1292_v38 }
 0x252   : > { %2021 = vmatprep.subr.bf16.mxu1 %v2495_v0 }
 0x253   : > { %2006 = vmatmul.mubr.msk.bf16.vlgmr.msra.gmra.mxu0 %vm1043_vm5, %v978_v23 }
 0x254   : > { %2017 = vmatprep.mubr.msk.bf16.mxu0 %vm2496_vm0, %v2495_v0 }
 0x264   : > { %v1234_v39 = vpop.permute.xlu1 %1233 }
 0x265   : > { %vm1235_vm6 = vcmp.eq.s32.totalorder %v1234_v39, 1 }
 0x2c0   : > { %v1085_v40 = vpop.f32.mrf.mxu1 }
 0x2c1   : > { %v1236_v41 = vsel %vm1235_vm6, -1e+09, %v1085_v40 }
 0x2c2   : > { %v1989_v42 = vpop.f32.mrf.mxu1  ;;  %v1240_v43 = vsel %vm1043_vm5, %v1236_v41, -inf }
 0x2c3   : > { %1241 = vmax.xlane.f32.xlu0 %v1240_v43 }
 0x2c4   : > { %v1088_v44 = vpop.f32.mrf.mxu1 }
 0x2c6   : > { %v1990_v45 = vpop.f32.mrf.mxu1 }
 0x2c7   : > { %v1477_v45 = vld [vmem:[#allocation15 + $0x4] sm:$0xf] }
 0x30b   : > { %v1131_v46 = vpop.f32.mrf.mxu0 }
 0x30c   : > { %v1237_v47 = vsel %vm1235_vm6, -1e+09, %v1131_v46  ;;  %v1530_v46 = vsel %vm1047_vm4, %v1477_v45, 0 }
 0x30d   : > { %v1995_v48 = vpop.f32.mrf.mxu0  ;;  %v1243_v49 = vsel %vm1043_vm5, %v1237_v47, -inf }
 0x30e   : > { %1244 = vmax.xlane.f32.xlu1 %v1243_v49 }
 0x30f   : > { %v1134_v50 = vpop.f32.mrf.mxu0  ;;  %v1177_v51 = vpop.f32.mrf.mxu1 }
 0x310   : > { %v1238_v52 = vsel %vm1235_vm6, -1e+09, %v1177_v51 }
 0x311   : > { %v1996_v53 = vpop.f32.mrf.mxu0  ;;  %v2001_v54 = vpop.f32.mrf.mxu1  ;;  %v1246_v55 = vsel %vm1043_vm5, %v1238_v52, -inf }
 0x312   : > { %1247 = vmax.xlane.f32.xlu0 %v1246_v55  ;;  %v1479_v54 = vld [vmem:[#allocation15 + $0xc] sm:$0xf] }
 0x313   : > { %v1180_v56 = vpop.f32.mrf.mxu1  ;;  %v1223_v57 = vpop.f32.mrf.mxu0 }
 0x314   : > { %v1239_v58 = vsel %vm1235_vm6, -1e+09, %v1223_v57  ;;  %v1622_v57 = vsel %vm1047_vm4, %v1479_v54, 0 }
 0x315   : > { %v2002_v59 = vpop.f32.mrf.mxu1  ;;  %v2007_v60 = vpop.f32.mrf.mxu0  ;;  %v1249_v61 = vsel %vm1043_vm5, %v1239_v58, -inf }
 0x316   : > { %1250 = vmax.xlane.f32.xlu0 %v1249_v61 }
 0x317   : > { %v1226_v62 = vpop.f32.mrf.mxu0 }
 0x319   : > { %v2008_v63 = vpop.f32.mrf.mxu0 }
 0x31f   : > { %913 = vrot.lane.b32.xlu1 %v2856_v37, %s2499_s15  ;;  %s1681_s15 = scalar_lea.sflag [#allocation6], %s2753_s16 }
 0x323   : > { %915 = vrot.lane.b32.xlu1 %v2856_v37, %s2497_s29 }
 0x34c   : > { %v1242_v1 = vpop.xlane.xlu0 %1241 }
 0x34d   : > { %v1252_v2 = vsub.f32 %v1236_v41, %v1242_v1 }
 0x34f   : > { %v1256_v3 = vmul.f32 1.442695, %v1252_v2 }
 0x351   : > { %2188 = vpow2.f32 %v1256_v3 }
 0x35e   : > { %v2189_v4 = vpop.eup %2188 }
 0x35f   : > { %v1264_v5 = vsel %vm1043_vm5, %v2189_v4, 0.0 }
 0x360   : > { %1265 = vadd.xlane.f32.xlu0 %v1264_v5 }
 0x397   : > { %v1245_v6 = vpop.xlane.xlu1 %1244 }
 0x398   : > { %v1253_v7 = vsub.f32 %v1237_v47, %v1245_v6  ;;  %v1478_v47 = vld [vmem:[#allocation15 + $0x8] sm:$0xf] }
 0x399   : > { %v1576_v50 = vsel %vm1047_vm4, %v1478_v47, 0 }
 0x39a   : > { %v1258_v8 = vmul.f32 1.442695, %v1253_v7 }
 0x39b   : > { %v1248_v9 = vpop.xlane.xlu0 %1247  ;;  %v914_v24 = vpop.permute.xlu1 %913 }
 0x39c   : > { %2190 = vpow2.f32 %v1258_v8  ;;  %v1254_v10 = vsub.f32 %v1238_v52, %v1248_v9  ;;  %v1384_v26 = vsel %vm1047_vm4, %v914_v24, 0 }
 0x39e   : > { %v1260_v11 = vmul.f32 1.442695, %v1254_v10 }
 0x39f   : > { %v1251_v12 = vpop.xlane.xlu0 %1250  ;;  %v916_v34 = vpop.permute.xlu1 %915 }
 0x3a0   : > { %2192 = vpow2.f32 %v1260_v11  ;;  %v1255_v13 = vsub.f32 %v1239_v58, %v1251_v12  ;;  %v1430_v38 = vsel %vm1047_vm4, %v916_v34, 0 }
 0x3a2   : > { %v1262_v14 = vmul.f32 1.442695, %v1255_v13 }
 0x3a4   : > { %2194 = vpow2.f32 %v1262_v14 }
 0x3a9   : > { %v2191_v15 = vpop.eup %2190 }
 0x3aa   : > { %v1267_v16 = vsel %vm1043_vm5, %v2191_v15, 0.0 }
 0x3ab   : > { %1268 = vadd.xlane.f32.xlu0 %v1267_v16 }
 0x3ad   : > { %v2193_v17 = vpop.eup %2192 }
 0x3ae   : > { %v1270_v18 = vsel %vm1043_vm5, %v2193_v17, 0.0 }
 0x3af   : > { %1271 = vadd.xlane.f32.xlu0 %v1270_v18 }
 0x3b1   : > { %v2195_v19 = vpop.eup %2194 }
 0x3b2   : > { %v1273_v20 = vsel %vm1043_vm5, %v2195_v19, 0.0 }
 0x3b3   : > { %1274 = vadd.xlane.f32.xlu0 %v1273_v20 }
 0x3c9   : > { %911 = vrot.lane.b32.xlu0 %v2856_v37, %s2498_s19  ;;  %v1476_v37 = vld [vmem:[#allocation15] sm:$0xf] }
 0x3ca   : > { %v1484_v41 = vsel %vm1047_vm4, %v1476_v37, 0 }
 0x3e9   : > { %v1266_v21 = vpop.xlane.xlu0 %1265 }
 0x3ea   : > { %2196 = vrcp.f32 %v1266_v21 }
 0x3f7   : > { %v2197_v22 = vpop.eup %2196 }
 0x3f8   : > { %v1280_v23 = vmul.f32 %v2197_v22, %v2189_v4 }
 0x3fa   : > { %v1284_v25 = vpack.c.bf16 %v1280_v23, %v1280_v23 }
 0x3fc   : > { %2012 = vmatmul.mubr.msk.bf16.vlgmr.msra.gmra.mxu1 %vm1043_vm5, %v1284_v25  ;;  %v1923_v25 = vld [vmem:[%s3032_s20] ss:$0 sm:$0xff] }
 0x3fd   : > { %2022 = vmatpush3.bf16.msra.mxu1 %v1384_v26  ;;  %2023 = vmatprep.mubr.msk.bf16.mxu1 %vm2496_vm0, %v2495_v0 }
 0x3fe   : > { %2033 = vmatprep.subr.bf16.mxu1 %v2495_v0 }
 0x434   : > { %v1269_v27 = vpop.xlane.xlu0 %1268 }
 0x435   : > { %2198 = vrcp.f32 %v1269_v27 }
 0x438   : > { %v1272_v28 = vpop.xlane.xlu0 %1271 }
 0x439   : > { %2200 = vrcp.f32 %v1272_v28 }
 0x43c   : > { %v1275_v29 = vpop.xlane.xlu0 %1274 }
 0x43d   : > { %2202 = vrcp.f32 %v1275_v29 }
 0x440   : > { %v912_v30 = vpop.permute.xlu0 %911 }
 0x441   : > { %v1338_v31 = vsel %vm1047_vm4, %v912_v30, 0 }
 0x442   : > { %v2199_v32 = vpop.eup %2198  ;;  %2016 = vmatpush3.bf16.msra.mxu0 %v1338_v31 }
 0x443   : > { %2027 = vmatprep.subr.bf16.mxu0 %v2495_v0  ;;  %v1281_v33 = vmul.f32 %v2199_v32, %v2191_v15 }
 0x445   : > { %v1285_v35 = vpack.c.bf16 %v1281_v33, %v1281_v33 }
 0x446   : > { %v2201_v36 = vpop.eup %2200 }
 0x447   : > { %2018 = vmatmul.mubr.msk.bf16.vlgmr.msra.gmra.mxu0 %vm1043_vm5, %v1285_v35  ;;  %v1282_v39 = vmul.f32 %v2201_v36, %v2193_v17 }
 0x448   : > { %2028 = vmatpush3.bf16.msra.mxu0 %v1430_v38  ;;  %2029 = vmatprep.mubr.msk.bf16.mxu0 %vm2496_vm0, %v2495_v0 }
 0x449   : > { %v1286_v40 = vpack.c.bf16 %v1282_v39, %v1282_v39  ;;  %2039 = vmatprep.subr.bf16.mxu0 %v2495_v0 }
 0x44a   : > { %v2203_v42 = vpop.eup %2202 }
 0x44b   : > { %2024 = vmatmul.mubr.msk.bf16.vlgmr.msra.gmra.mxu1 %vm1043_vm5, %v1286_v40  ;;  %v1283_v43 = vmul.f32 %v2203_v42, %v2195_v19 }
 0x44c   : > { %2034 = vmatpush3.bf16.msra.mxu1 %v1484_v41  ;;  %2035 = vmatprep.mubr.msk.bf16.mxu1 %vm2496_vm0, %v2495_v0 }
 0x44d   : > { %v1287_v44 = vpack.c.bf16 %v1283_v43, %v1283_v43  ;;  %2045 = vmatprep.subr.bf16.mxu1 %v2495_v0 }
 0x44f   : > { %2030 = vmatmul.mubr.msk.bf16.vlgmr.msra.gmra.mxu0 %vm1043_vm5, %v1287_v44 }
 0x450   : > { %2041 = vmatprep.mubr.msk.bf16.mxu0 %vm2496_vm0, %v2495_v0  ;;  %2040 = vmatpush3.bf16.msra.mxu0 %v1530_v46 }
 0x451   : > { %2051 = vmatprep.subr.bf16.mxu0 %v2495_v0 }
 0x4bc   : > { %v1328_v48 = vpop.f32.mrf.mxu1 }
 0x4bd   : > { %v1472_v49 = vpack.c.bf16 %v1328_v48, %v1328_v48 }
 0x4be   : > { %v2013_v51 = vpop.f32.mrf.mxu1 }
 0x4bf   : > { %2036 = vmatmul.mubr.msk.bf16.vlgmr.msra.gmra.mxu1 %vm1043_vm5, %v1472_v49 }
 0x4c0   : > { %v1331_v52 = vpop.f32.mrf.mxu1  ;;  %2046 = vmatpush3.bf16.msra.mxu1 %v1576_v50  ;;  %2047 = vmatprep.mubr.msk.bf16.mxu1 %vm2496_vm0, %v2495_v0 }
 0x4c2   : > { %v2014_v53 = vpop.f32.mrf.mxu1 }
 0x507   : > { %v1374_v55 = vpop.f32.mrf.mxu0 }
 0x508   : > { %v1473_v56 = vpack.c.bf16 %v1374_v55, %v1374_v55 }
 0x509   : > { %v2019_v58 = vpop.f32.mrf.mxu0 }
 0x50a   : > { %2042 = vmatmul.mubr.msk.bf16.vlgmr.msra.gmra.mxu0 %vm1043_vm5, %v1473_v56 }
 0x50b   : > { %v1377_v59 = vpop.f32.mrf.mxu0  ;;  %v1420_v60 = vpop.f32.mrf.mxu1  ;;  %2052 = vmatpush3.bf16.msra.mxu0 %v1622_v57  ;;  %2053 = vmatprep.mubr.msk.bf16.mxu0 %vm2496_vm0, %v2495_v0 }
 0x50c   : > { %v1474_v61 = vpack.c.bf16 %v1420_v60, %v1420_v60 }
 0x50d   : > { %v2020_v62 = vpop.f32.mrf.mxu0  ;;  %v2025_v63 = vpop.f32.mrf.mxu1 }
 0x50e   : > { %2048 = vmatmul.mubr.msk.bf16.vlgmr.msra.gmra.mxu1 %vm1043_vm5, %v1474_v61 }
 0x50f   : > { %v1423_v1 = vpop.f32.mrf.mxu1  ;;  %v1466_v2 = vpop.f32.mrf.mxu0 }
 0x510   : > { %v1475_v3 = vpack.c.bf16 %v1466_v2, %v1466_v2 }
 0x511   : > { %v2026_v4 = vpop.f32.mrf.mxu1  ;;  %v2031_v5 = vpop.f32.mrf.mxu0 }
 0x512   : > { %2054 = vmatmul.mubr.msk.bf16.vlgmr.msra.gmra.mxu0 %vm1043_vm5, %v1475_v3 }
 0x513   : > { %v1469_v6 = vpop.f32.mrf.mxu0 }
 0x515   : > { %v2032_v7 = vpop.f32.mrf.mxu0 }
 0x57f   : > { %v1520_v8 = vpop.f32.mrf.mxu1 }
 0x580   : > { %v1664_v16 = vsel %vm629_vm1, %v1520_v8, 0.0 }
 0x581   : > { %v2037_v9 = vpop.f32.mrf.mxu1 }
 0x583   : > { %v1523_v10 = vpop.f32.mrf.mxu1 }
 0x585   : > { %v2038_v11 = vpop.f32.mrf.mxu1 }
 0x5ca   : > { %v1566_v0 = vpop.f32.mrf.mxu0 }
 0x5cb   : > { %v1665_v13 = vsel %vm629_vm1, %v1566_v0, 0.0 }
 0x5cc   : > { %v2043_v12 = vpop.f32.mrf.mxu0  ;;  %v1666_v18 = vadd.f32 %v1665_v13, %v1664_v16 }
 0x5ce   : > { %v1569_v14 = vpop.f32.mrf.mxu0  ;;  %v1612_v15 = vpop.f32.mrf.mxu1 }
 0x5cf   : > { %v1667_v17 = vsel %vm629_vm1, %v1612_v15, 0.0 }
 0x5d0   : > { %v2044_v19 = vpop.f32.mrf.mxu0  ;;  %v2049_v20 = vpop.f32.mrf.mxu1  ;;  %v1668_v21 = vadd.f32 %v1667_v17, %v1666_v18 }
 0x5d2   : > { %v1615_v22 = vpop.f32.mrf.mxu1  ;;  %v1658_v23 = vpop.f32.mrf.mxu0 }
 0x5d3   : > { %v1669_v24 = vsel %vm629_vm1, %v1658_v23, 0.0 }
 0x5d4   : > { %v1670_v26 = vadd.f32 %v1669_v24, %v1668_v21  ;;  %v2050_v27 = vpop.f32.mrf.mxu1  ;;  %v2055_v28 = vpop.f32.mrf.mxu0 }
 0x5d6   : > { %v1678_v29 = vadd.f32 %v1923_v25, %v1670_v26  ;;  %v1661_v30 = vpop.f32.mrf.mxu0 }
 0x5d8   : > { %v2056_v31 = vpop.f32.mrf.mxu0  ;;  %1679 = vst.msk [vmem:[%s591_s18] sm:$0xff] %vm629_vm1, %v1678_v29 }
 0x5d9   : > { %2405 = shalt.err (!%p2402_p5)
}
 0x5da   : > { %s2406_s25 = scalar_lea.hbm %s2923_s21, 128  ;;  %s2410_s13 = scalar_lea.hbm %s3034_s11, 256 }
 0x5db   : > { %p2407_p6 = scmp.ne.s32.totalorder %s2923_s21, %s2406_s25  ;;  %p2411_p7 = scmp.lt.s32.totalorder %s2923_s21, %s3034_s11 }
 0x5dc   : > { %p2412_p8 = scmp.lt.s32.totalorder %s2410_s13, %s2406_s25 }
 0x5dd   : > { %p2408_p4 = pnand %p2407_p6, %p3035_p13 }
 0x5de   : > { %p2413_p9 = por %p2412_p8, %p2411_p7 }
 0x5df   : > { %p2409_p3 = pneg %p2408_p4 }
 0x5e1   : > { %p2414_p1 = pnand %p2413_p9, %p2409_p3 }
 0x5e3   : > { %2417 = shalt.err (!%p2414_p1)
}
 0x5e4   : > { %2079 = dma.vmem_to_hbm [thread:$0]  (%p3035_p13), %s1696_s30, 128, %s2923_s21, %s1681_s15  }
 0x5e5 PF: > { %s3036_s2 = sld [smem:[#allocation22_spill]] }
 0x5e6   : > { %s3037_s27 = sld [smem:[#allocation28_spill]] }
 0x5e7   : > { %s3038_s20 = sld [smem:[#allocation24_spill]] }
 0x5eb   : > { %s1707_s26 = sand.u32 1, %s3036_s2  }
 0x5ec   : > { %p3039_p2 = scmp.ne.s32.totalorder %s3037_s27, 0  ;;  %s1708_s18 = scalar_lea.sflag [#allocation6], %s1707_s26 }
 0x5ed   : > { %p3040_p11 = scmp.ge.s32.totalorder %s3038_s20, 2 }
 0x5ef   : > { %p2105_p10 = pnand %p3040_p11, %p3039_p2 }
 0x5f1   : > { %p2106_p0 = pneg %p2105_p10 }
 0x5f3   : > { %2459 = dma.done.wait (%p2106_p0), %s1708_s18, 128  }
 0x5f4   : > { %2461 = vsyncadd (%p2106_p0), %s1708_s18, 4294967168  ;;  %s33_s26 = sadd.s32 1, %s3038_s20   ;;  %s3041_s5 = sld [smem:[#allocation27_spill]] }
 0x5f5   : > { %p30_p12 = scmp.ge.s32.totalorder %s33_s26, 4   ;;  %s3042_s24 = sld [smem:[#allocation23_spill]] }
 0x5f6   : > { %s3043_s25 = sld [smem:[#allocation25_spill]]  ;;  %s3044_s21 = smov %s2468_s22 }
 0x5f7   : > { %s3045_s22 = smov %s2472_s23  ;;  %32 = sbr.rel (!%p30_p12) target bundleno = 17 (0x11), region = 160 }
 0x5fa   : > { %s3046_s23 = smov %s3041_s5 }
 0x5fc   :  { %1713 = vsyncpa [#allocation5], 1 }
 0x5fd   :  { %1715 = vsyncpa [#allocation5 + $0x1], 1 }
 0x5fe   :  { %1716 = vsyncpa [#allocation8], 1 }
 0x5ff   :  { %1718 = vsyncpa [#allocation8 + $0x1], 1 }
 0x600   :  { %1719 = vsyncpa [#allocation11], 1 }
 0x601   :  { %1720 = vsyncpa [#allocation14], 1 }
 0x602   :  { %1721 = vsyncpa [#allocation6], 1 }
 0x603   :  { %1723 = vsyncpa [#allocation6 + $0x1], 1 }

// kernel: tpu_custom_call.1
= control target key start
LH: loop header
LB: loop body
LE: loop exit
PB: predicated region body
PF: predicated region fallthrough
CT: control target
= control target key end

     0   :  { %s2966_s0 = inlined_call_operand.vmem [shape: f32[2,8,1], index: 0, kind: input, shape index: {}]   ;;  %s2967_s1 = inlined_call_operand.hbm [shape: bf16[2,8,32], index: 1, kind: input, shape index: {}]   ;;  %s2968_s2 = inlined_call_operand.hbm [shape: bf16[2,8,32], index: 2, kind: input, shape index: {}]   ;;  %s2969_s3 = inlined_call_operand.hbm [shape: bf16[2,8,32], index: 3, kind: input, shape index: {}]   ;;  %s2970_s4 = inlined_call_operand.vmem [shape: bf16[32,32], index: 4, kind: input, shape index: {}]   ;;  %s2971_s5 = inlined_call_operand.hbm [shape: f32[1,32], index: 5, kind: input, shape index: {}]   ;;  %s2972_s6 = inlined_call_operand.hbm [shape: bf16[32,32], index: 6, kind: input, shape index: {}]   ;;  %s2973_s7 = inlined_call_operand.hbm [shape: f32[1,32], index: 7, kind: input, shape index: {}]   ;;  %s2974_s8 = inlined_call_operand.vmem [shape: bf16[32,32], index: 8, kind: input, shape index: {}]   ;;  %s2975_s9 = inlined_call_operand.vmem [shape: f32[1,32], index: 9, kind: input, shape index: {}]   ;;  %s2976_s10 = inlined_call_operand.hbm [shape: bf16[4,8,32], index: 10, kind: input, shape index: {}]   ;;  %s2977_s11 = inlined_call_operand.vmem [shape: f32[1,32], index: 11, kind: input, shape index: {}]   ;;  %s2978_s12 = inlined_call_operand.hbm [shape: f32[2,8,32], index: 12, kind: output, shape index: {}]  }
   0x1   :  { %2995 = sst [smem:[#allocation29_spill]] %s2968_s2 }
   0x2   :  { %2996 = sst [smem:[#allocation30_spill]] %s2971_s5 }
   0x3   :  { %2997 = sst [smem:[#allocation31_spill]] %s2972_s6 }
   0x4   :  { %2998 = sst [smem:[#allocation32_spill]] %s2973_s7 }
   0x5   :  { %2999 = sst [smem:[#allocation33_spill]] %s2977_s11 }
   0x6   :  { %3000 = sst [smem:[#allocation34_spill]] %s2978_s12 }
   0x7   :  { %17 = vsyncpa [#allocation5], 0 }
   0x8   :  { %19 = vsyncpa [#allocation5 + $0x1], 0 }
   0x9   :  { %20 = vsyncpa [#allocation8], 0 }
   0xa   :  { %22 = vsyncpa [#allocation8 + $0x1], 0 }
   0xb   :  { %23 = vsyncpa [#allocation11], 0 }
   0xc   :  { %24 = vsyncpa [#allocation14], 0 }
   0xd   :  { %25 = vsyncpa [#allocation6], 0 }
   0xe   :  { %27 = vsyncpa [#allocation6 + $0x1], 0  ;;  %s2569_s21 = smov 0   ;;  %s2571_s22 = smov 0  }
   0xf   :  { %s2573_s23 = smov 0   ;;  %s2575_s24 = smov 0  }
  0x10   :  { %s2577_s25 = smov 0   ;;  %s2579_s26 = smov 0  }
  0x11 LB: > { %3001 = sst [smem:[#allocation22_spill]] %s2464_s21  ;;  %s2600_s27 = sadd.s32 4294967295, %s2484_s26   ;;  %s2484_s26 = sphi %s2579_s26, %s33_s26   ;;  %s2480_s25 = sphi %s2577_s25, %s3043_s25   ;;  %s2476_s24 = sphi %s2575_s24, %s3042_s24   ;;  %s2472_s23 = sphi %s2573_s23, %s3046_s23   ;;  %s2468_s22 = sphi %s2571_s22, %s3045_s22   ;;  %s2464_s21 = sphi %s2569_s21, %s3044_s21  }
  0x12   : > { %3002 = sst [smem:[#allocation23_spill]] %s2480_s25  ;;  %p1873_p0 = scmp.ge.s32.totalorder %s2484_s26, 1 }
  0x13   : > { %3003 = sst [smem:[#allocation24_spill]] %s2484_s26  ;;  %p2979_p1 = scmp.eq.s32.totalorder %s2600_s27, 0 }
  0x14   : > { %p354_p2 = scmp.lt.s32.totalorder %s2484_s26, 3  ;;  %s2486_s29 = smov [#allocation10]  }
  0x15   : > { %s370_s30 = sshll.u32 %s2486_s29, 4  ;;  %s2487_s13 = smov [#allocation13]   ;;  %s371_s30 = int_to_ptr.vmem [resolvable:$true] %s370_s30 }
  0x16   : > { %p2605_p3 = pnand %p1873_p0, %p354_p2  ;;  %s394_s14 = sshll.u32 %s2487_s13, 4  ;;  %s395_s14 = int_to_ptr.vmem [resolvable:$true] %s394_s14 }
  0x17   : > { %s2215_s16 = scalar_lea.vmem %s371_s30, 16  ;;  %s2222_s17 = scalar_lea.vmem %s371_s30, 32 }
  0x18   : > { %s3004_s28 = scalar_select %p2605_p3, 1, 0 }
  0x19   : > { %p2081_p5 = pneg %p2605_p3  ;;  %p2216_p8 = scmp.ne.s32.totalorder %s371_s30, %s2215_s16 }
  0x1a   : > { %p2223_p11 = scmp.lt.s32.totalorder %s371_s30, %s371_s30  ;;  %p2224_p12 = scmp.lt.s32.totalorder %s2222_s17, %s2215_s16 }
  0x1b   : > { %p2614_p6 = pnand %p2081_p5, %p2979_p1 }
  0x1c   : > { %p2225_p13 = por %p2224_p12, %p2223_p11 }
  0x1d   : > { %p2990_p7 = pneg %p2614_p6 }
  0x1f   : > { %p2218_p9 = pnand %p2216_p8, %p2990_p7 }
  0x21   : > { %p2219_p10 = pneg %p2218_p9 }
  0x23   : > { %p2226_p0 = pnand %p2225_p13, %p2219_p10 }
  0x25   : > { %2229 = shalt.err (!%p2226_p0)
}
  0x26   : > { %s3006_s5 = sld [smem:[#allocation30_spill]]  ;;  %s2241_s20 = scalar_lea.vmem %s395_s14, 16 }
  0x27   : > { %p2242_p2 = scmp.ne.s32.totalorder %s395_s14, %s2241_s20  ;;  %s2248_s29 = scalar_lea.vmem %s395_s14, 32 }
  0x28   : > { %p2249_p9 = scmp.lt.s32.totalorder %s395_s14, %s395_s14  ;;  %p2250_p4 = scmp.lt.s32.totalorder %s2248_s29, %s2241_s20 }
  0x29   : > { %p2244_p5 = pnand %p2242_p2, %p2990_p7 }
  0x2a   : > { %p2251_p1 = por %p2250_p4, %p2249_p9 }
  0x2b   : > { %p2245_p8 = pneg %p2244_p5 }
  0x2c   : > { %2084 = dma.hbm_to_vmem [thread:$0]  (!%p2614_p6), %s3006_s5, 16, %s371_s30, [#allocation11]  }
  0x2d   : > { %p2252_p11 = pnand %p2251_p1, %p2245_p8 }
  0x2f   : > { %2255 = shalt.err (!%p2252_p11)
}
  0x30   : > { %s3007_s7 = sld [smem:[#allocation32_spill]]  ;;  %s1872_s30 = sadd.s32 4294967294, %s2484_s26  }
  0x31   : > { %s45_s17 = sadd.s32 1, %s2480_s25  ;;  %s82_s18 = sadd.s32 1, %s2472_s23 }
  0x32   : > { %p47_p1 = scmp.ge.s32.totalorder %s45_s17, 2  ;;  %p89_p4 = scmp.ne.s32.totalorder %s2472_s23, %s2468_s22 }
  0x33   : > { %p90_p10 = scmp.eq.s32.totalorder %s2484_s26, 0  ;;  %p95_p13 = scmp.ne.s32.totalorder %s2468_s22, %s2464_s21 }
  0x34   : > { %s3048_s17 = smov (%p47_p1, %s45_s17), 0  ;;  %p341_p0 = scmp.eq.s32.totalorder %s2600_s27, 1 }
  0x35   : > { %3008 = sst [smem:[#allocation25_spill]] %s3048_s17  ;;  %p2644_p12 = por %p90_p10, %p89_p4 }
  0x36   : > { %2090 = dma.hbm_to_vmem [thread:$0]  (!%p2614_p6), %s3007_s7, 16, %s395_s14, [#allocation14]  }
  0x37   : > { %s77_s14 = ssub.s32 %s2480_s25, %s3048_s17  ;;  %p3010_p5 = scmp.eq.s32.totalorder %s2600_s27, 0 }
  0x38   : > { %p80_p2 = scmp.eq.s32.totalorder %s77_s14, 0  ;;  %p2659_p9 = por %p341_p0, %p89_p4 }
  0x39   : > { %p2655_p8 = por %p3010_p5, %p95_p13  ;;  %p347_p11 = scmp.eq.s32.totalorder %s1872_s30, 1 }
  0x3a   : > { %s3012_s29 = scalar_select %p2659_p9, 1, 0 }
  0x3b   : > { %s3011_s20 = scalar_select %p2655_p8, 1, 0 }
  0x3c   : > { %3013 = sst [smem:[#allocation26_spill]] %s3012_s29  ;;  %p2666_p1 = por %p347_p11, %p95_p13 }
  0x3d   : > { %s2664_s13 = scalar_select %p80_p2, %s2472_s23, %s82_s18  }
  0x3e   : > { %s3015_s16 = scalar_select %p2666_p1, 1, 0 }
  0x3f   : > { %3014 = sst [smem:[#allocation27_spill]] %s2664_s13  ;;  %p2112_p10 = scmp.lt.s32.totalorder %s2484_s26, 2 }
  0x40   : > { %3016 = sst [smem:[#allocation28_spill]] %s3015_s16  ;;  %s2985_s5 = sand.u32 1, %s2472_s23  }
  0x41   : > { %s2673_s7 = sshll.u32 %s2480_s25, 6  ;;  %s2677_s14 = sshll.u32 %s2985_s5, 2 }
  0x42   : > { %p2681_p4 = pnand %p2112_p10, %p2644_p12  ;;  %s456_s30 = sand.u32 1, %s2484_s26  }
  0x43   : > { %s3018_s2 = sld [smem:[#allocation29_spill]]  ;;  %s460_s21 = scalar_lea.vmem [#allocation7], %s2677_s14 }
  0x44   : > { %s467_s25 = sshll.u32 %s460_s21, 4  ;;  %s2691_s12 = scalar_lea.sflag [#allocation8], %s456_s30  ;;  %s468_s25 = int_to_ptr.vmem [resolvable:$true] %s467_s25 }
  0x45   : > { %p2991_p13 = pneg %p2681_p4  ;;  %s2269_s19 = scalar_lea.vmem %s468_s25, 64 }
  0x46   : > { %p2270_p0 = scmp.ne.s32.totalorder %s468_s25, %s2269_s19  ;;  %s2488_s5 = smov [#allocation7]  }
  0x47   : > { %s2274_s29 = sshll.u32 %s2488_s5, 4  ;;  %s2275_s29 = int_to_ptr.vmem [resolvable:$false] %s2274_s29 }
  0x48   : > { %p2272_p12 = pnand %p2270_p0, %p2991_p13  ;;  %s2276_s26 = scalar_lea.vmem %s2275_s29, 128 }
  0x49   : > { %s465_s16 = scalar_lea.hbm %s3018_s2, %s2673_s7  ;;  %p2277_p5 = scmp.lt.s32.totalorder %s468_s25, %s2275_s29 }
  0x4a   : > { %p2273_p2 = pneg %p2272_p12  ;;  %p2278_p11 = scmp.lt.s32.totalorder %s2276_s26, %s2269_s19 }
  0x4c   : > { %p2279_p10 = por %p2278_p11, %p2277_p5 }
  0x4e   : > { %p2280_p7 = pnand %p2279_p10, %p2273_p2 }
  0x50   : > { %2283 = shalt.err (!%p2280_p7)
}
  0x51   : > { %2100 = dma.hbm_to_vmem [thread:$0]  (!%p2681_p4), %s465_s16, 64, %s468_s25, %s2691_s12  }
  0x52   : > { %s2489_s21 = smov [#allocation12]   ;;  %p3019_p12 = pneg %p2614_p6 }
  0x53   : > { %s380_s13 = sshll.u32 %s2489_s21, 4  ;;  %s381_s13 = int_to_ptr.vmem [resolvable:$true] %s380_s13 }
  0x54   : > { %s2295_s30 = scalar_lea.vmem %s381_s13, 256  ;;  %p2303_p9 = scmp.lt.s32.totalorder %s381_s13, %s381_s13 }
  0x55   : > { %p2296_p0 = scmp.ne.s32.totalorder %s381_s13, %s2295_s30  ;;  %p2304_p8 = scmp.lt.s32.totalorder %s2295_s30, %s2295_s30 }
  0x57   : > { %p2298_p13 = pnand %p2296_p0, %p3019_p12  ;;  %p2305_p3 = por %p2304_p8, %p2303_p9 }
  0x59   : > { %p2299_p1 = pneg %p2298_p13 }
  0x5b   : > { %p2306_p5 = pnand %p2305_p3, %p2299_p1 }
  0x5d   : > { %2309 = shalt.err (!%p2306_p5)
}
  0x5e   : > { %s2490_s5 = smov 64   ;;  %s2491_s26 = smov 4  }
  0x5f   : > { %s3020_s6 = sld [smem:[#allocation31_spill]]  ;;  %s2492_s16 = smov [#allocation15]  }
  0x60   : > { %s410_s18 = sshll.u32 %s2492_s16, 4  ;;  %p3021_p7 = pmov %p3019_p12  ;;  %s411_s18 = int_to_ptr.vmem [resolvable:$true] %s410_s18 }
  0x61   : > { %s2321_s2 = scalar_lea.vmem %s411_s18, 256  ;;  %p2329_p1 = scmp.lt.s32.totalorder %s411_s18, %s411_s18 }
  0x62   : > { %p2322_p3 = scmp.ne.s32.totalorder %s411_s18, %s2321_s2  ;;  %p2330_p13 = scmp.lt.s32.totalorder %s2321_s2, %s2321_s2 }
  0x64   : > { %p2324_p8 = pnand %p2322_p3, %p3021_p7  ;;  %p2331_p2 = por %p2330_p13, %p2329_p1 }
  0x65   : > { %2087 = dma.hbm_to_vmem [thread:$0]  (!%p2614_p6), %s3020_s6, 256, %s381_s13, [#allocation11], %s2490_s5, %s2490_s5, %s2491_s26  }
  0x66   : > { %p2325_p9 = pneg %p2324_p8 }
  0x68   : > { %p2332_p11 = pnand %p2331_p2, %p2325_p9 }
  0x6a   : > { %2335 = shalt.err (!%p2332_p11)
}
  0x6b   : > { %2093 = dma.hbm_to_vmem [thread:$0]  (!%p2614_p6), %s2976_s10, 256, %s411_s18, [#allocation14], %s2490_s5, %s2490_s5, %s2491_s26  }
  0x6c   : > { %s441_s29 = scalar_lea.vmem [#allocation4], %s2677_s14  ;;  %s483_s2 = scalar_lea.hbm %s2969_s3, %s2673_s7 }
  0x6d   : > { %s449_s16 = sshll.u32 %s441_s29, 4  ;;  %s3022_s30 = sand.u32 1, %s2472_s23   ;;  %s450_s16 = int_to_ptr.vmem [resolvable:$true] %s449_s16 }
  0x6e   : > { %s438_s6 = scalar_lea.sflag [#allocation5], %s3022_s30  ;;  %s2349_s11 = scalar_lea.vmem %s450_s16, 64 }
  0x6f   : > { %p2350_p10 = scmp.ne.s32.totalorder %s450_s16, %s2349_s11  ;;  %p3023_p0 = pneg %p2681_p4 }
  0x70   : > { %s2493_s15 = smov [#allocation4]  }
  0x71   : > { %p2352_p12 = pnand %p2350_p10, %p3023_p0  ;;  %s2354_s13 = sshll.u32 %s2493_s15, 4  ;;  %s2355_s13 = int_to_ptr.vmem [resolvable:$false] %s2354_s13 }
  0x72   : > { %s2356_s25 = scalar_lea.vmem %s2355_s13, 128  ;;  %p2357_p6 = scmp.lt.s32.totalorder %s450_s16, %s2355_s13 }
  0x73   : > { %p2353_p5 = pneg %p2352_p12  ;;  %p2358_p3 = scmp.lt.s32.totalorder %s2356_s25, %s2349_s11 }
  0x75   : > { %p2359_p7 = por %p2358_p3, %p2357_p6 }
  0x77   : > { %p2360_p8 = pnand %p2359_p7, %p2353_p5 }
  0x79   : > { %2363 = shalt.err (!%p2360_p8)
}
  0x7a   : > { %s3024_s18 = scalar_lea.hbm %s2967_s1, %s2673_s7  ;;  %s478_s30 = scalar_lea.vmem [#allocation9], %s2677_s14 }
  0x7b   : > { %2097 = dma.hbm_to_vmem [thread:$0]  (!%p2681_p4), %s3024_s18, 64, %s450_s16, %s438_s6  }
  0x7c   : > { %s485_s29 = sshll.u32 %s478_s30, 4  ;;  %p3025_p1 = pmov %p3023_p0  ;;  %s486_s29 = int_to_ptr.vmem [resolvable:$true] %s485_s29 }
  0x7d   : > { %s2377_s19 = scalar_lea.vmem %s486_s29, 64  ;;  %s2494_s11 = smov [#allocation9]  }
  0x7e   : > { %p2378_p9 = scmp.ne.s32.totalorder %s486_s29, %s2377_s19  ;;  %s2382_s21 = sshll.u32 %s2494_s11, 4  ;;  %s2383_s21 = int_to_ptr.vmem [resolvable:$false] %s2382_s21 }
  0x7f   : > { %s2384_s15 = scalar_lea.vmem %s2383_s21, 128  ;;  %p2385_p11 = scmp.lt.s32.totalorder %s486_s29, %s2383_s21 }
  0x80   : > { %p2380_p13 = pnand %p2378_p9, %p3025_p1  ;;  %p2386_p10 = scmp.lt.s32.totalorder %s2384_s15, %s2377_s19 }
  0x82   : > { %p2381_p2 = pneg %p2380_p13  ;;  %p2387_p0 = por %p2386_p10, %p2385_p11 }
  0x84   : > { %p2388_p12 = pnand %p2387_p0, %p2381_p2 }
  0x86   : > { %2391 = shalt.err (!%p2388_p12)
}
  0x87   : > { %2103 = dma.hbm_to_vmem [thread:$0]  (!%p2681_p4), %s483_s2, 64, %s486_s29, %s2691_s12  }
  0x88   : > { %p3026_p5 = scmp.ne.s32.totalorder %s3004_s28, 0 }
  0x89   : > { %s2753_s16 = sand.u32 (!%p3026_p5), 1, %s2468_s22   ;;  %p3027_p6 = scmp.ne.s32.totalorder (!%p3026_p5), %s3011_s20, 0 }
  0x8a   : > { %494 = sbr.rel (%p3026_p5) target bundleno = 1509 (0x5e5), region = 68  ;;  %s2756_s13 = sshll.u32 (!%p3026_p5), %s2753_s16, 2 }
  0x8b   : > { %s497_s17 = scalar_lea.sflag (!%p3026_p5), [#allocation5], %s2753_s16  ;;  %s500_s25 = scalar_lea.vmem (!%p3026_p5), [#allocation4], %s2756_s13 }
  0x8f   : > { %2443 = dma.done.wait (%p3027_p6), %s497_s17, 64  }
  0x90   : > { %2445 = vsyncadd (%p3027_p6), %s497_s17, 4294967232  ;;  %s505_s7 = sand.u32 1, %s2600_s27   ;;  %s509_s28 = scalar_lea.vmem [#allocation7], %s2756_s13 }
  0x91   : > { %s506_s12 = scalar_lea.sflag [#allocation8], %s505_s7 }
  0x92   : > { %2447 = dma.done.wait (%p3027_p6), %s506_s12, 128  }
  0x93   : > { %2449 = vsyncadd (%p3027_p6), %s506_s12, 4294967168  ;;  %s518_s2 = scalar_lea.vmem [#allocation9], %s2756_s13  ;;  %p3028_p4 = scmp.eq.s32.totalorder %s2600_s27, 0 }
  0x95   : > { %2451 = dma.done.wait (%p3028_p4), [#allocation11], 272   ;;  %p3029_p3 = pmov %p3028_p4 }
  0x97   : > { %2453 = vsyncadd (%p3029_p3), [#allocation11], 4294967024  ;;  %p3030_p7 = pmov %p3029_p3 }
  0x98   : > { %p3031_p8 = pmov %p3029_p3 }
  0x99   : > { %2455 = dma.done.wait (%p3030_p7), [#allocation14], 272  }
  0x9a   : > { %2457 = vsyncadd (%p3031_p8), [#allocation14], 4294967024  ;;  %v2495_v0 = vmov 0.0   ;;  %vm2496_vm0 = vmmov 0   ;;  %v2182_v1 = vld [vmem:[#allocation12 + $0x8] sm:$0xff]   ;;  %v2183_v2 = vld [vmem:[#allocation12] sm:$0xff]   ;;  %v827_v27 = vlaneseq }
  0x9b   : > { %1961 = vmatprep.subr.bf16.mxu0 %v2495_v0  ;;  %1965 = vmatprep.mubr.msk.bf16.mxu0 %vm2496_vm0, %v2495_v0  ;;  %v604_v3 = vld [vmem:[%s509_s28] sm:$0xf]  ;;  %vm629_vm1 = vcmask 261120   ;;  %v2184_v4 = vld [vmem:[%s2970_s4 + $0x8] sm:$0xff]   ;;  %v744_v6 = vld [vmem:[%s500_s25] sm:$0xf] }
  0x9c   : > { %1969 = vmatprep.subr.bf16.mxu1 %v2495_v0  ;;  %1973 = vmatprep.mubr.msk.bf16.mxu1 %vm2496_vm0, %v2495_v0  ;;  %v2185_v5 = vld [vmem:[%s2970_s4] sm:$0xff]   ;;  %vm740_vm2 = vcmask 257024   ;;  %v1903_v15 = vld [vmem:[#allocation10] ss:$0 sm:$0xff]  ;;  %v2186_v19 = vld [vmem:[%s2974_s8 + $0x8] sm:$0xff]   ;;  %s2497_s29 = smov 104  }
  0x9d   : > { %1962 = vmatpush3.bf16.msra.mxu0 %v2182_v1  ;;  %v1895_v7 = vld [vmem:[#allocation13] ss:$0 sm:$0xff]  ;;  %s2498_s19 = smov 120   ;;  %1970 = vmatpush3.bf16.msra.mxu1 %v2186_v19  ;;  %s2499_s15 = smov 112   ;;  %v605_v23 = vld [vmem:[%s518_s2] sm:$0xf] }
  0x9e   : > { %1963 = vmatprep.subr.bf16.mxu0 %v2495_v0  ;;  %1971 = vmatprep.subr.bf16.mxu1 %v2495_v0  ;;  %v2187_v22 = vld [vmem:[%s2974_s8] sm:$0xff]   ;;  %p592_p9 = scmp.lt.s32.totalorder %s2476_s24, 1  ;;  %v2500_v25 = vmov 1983009808   ;;  %v2501_v30 = vmov 1934713408  }
  0x9f   : > { %v825_v26 = vunpack.c.l.s4 %v2500_v25  ;;  %v857_v31 = vunpack.c.l.s4 %v2501_v30  ;;  %v828_v33 = vshrl.u32 %v827_v27, 7  ;;  %v2502_v34 = vmov 0   ;;  %s1893_s28 = sshll.u32 %s2753_s16, 3  ;;  %s3032_s20 = sld [smem:[#allocation33_spill]] }
  0xa0   : > { %s593_s6 = scalar_select %p592_p9, %s2476_s24, 1  ;;  %vm1047_vm4 = vcmask 1043456   ;;  %vm1043_vm5 = vcmask 64512  }
  0xa1   : > { %1964 = vmatpush3.bf16.msra.mxu0 %v2183_v2  ;;  %1972 = vmatpush3.bf16.msra.mxu1 %v2187_v22  ;;  %v826_v32 = vunpack.c.0.s8 %v825_v26  ;;  %v858_v38 = vunpack.c.0.s8 %v857_v31  ;;  %s3033_s5 = sld [smem:[#allocation26_spill]]  ;;  %s1925_s26 = sshll.u32 %s2476_s24, 7 }
  0xa2   : > { %1977 = vmatprep.subr.bf16.mxu0 %v2495_v0  ;;  %1985 = vmatprep.subr.bf16.mxu1 %v2495_v0  ;;  %s1894_s14 = sshll.u32 %s593_s6, 3  ;;  %s591_s18 = scalar_lea.vmem [#allocation16], %s1893_s28 }
  0xa3   : > { %s598_s7 = scalar_lea.vmem %s2966_s0, %s1894_s14  ;;  %v829_v39 = vsub.s32 %v826_v32, %v828_v33  ;;  %v861_v46 = vsub.s32 %v858_v38, %v828_v33  ;;  %s1695_s30 = sshll.u32 %s591_s18, 4  ;;  %s1696_s30 = int_to_ptr.vmem [resolvable:$true] %s1695_s30 }
  0xa4   : > { %1966 = vmatmul.mubr.msk.bf16.vlgmr.msra.gmra.mxu0 %vm629_vm1, %v604_v3  ;;  %1974 = vmatmul.mubr.msk.bf16.vlgmr.msra.gmra.mxu1 %vm629_vm1, %v605_v23  ;;  %v1229_v24 = vld [vmem:[%s598_s7] sm:$0xff]  ;;  %s3034_s11 = sld [smem:[#allocation34_spill]]  ;;  %s2392_s6 = scalar_lea.vmem %s1696_s30, 128 }
  0xa5   : > { %1978 = vmatpush3.bf16.msra.mxu0 %v2184_v4  ;;  %1981 = vmatprep.mubr.msk.bf16.mxu0 %vm2496_vm0, %v2495_v0  ;;  %vm1230_vm3 = vcmp.gt.f32.partialorder %v1229_v24, 0.0  ;;  %v1899_v24 = vld [vmem:[%s2975_s9] ss:$0 sm:$0xff]  ;;  %p2393_p1 = scmp.ne.s32.totalorder %s1696_s30, %s2392_s6  ;;  %s2503_s24 = smov [#allocation16]  }
  0xa6   : > { %1979 = vmatprep.subr.bf16.mxu0 %v2495_v0  ;;  %1987 = vmatprep.mubr.msk.bf16.mxu1 %vm2496_vm0, %v2495_v0  ;;  %v1231_v35 = vsel %vm1230_vm3, 1, %v2502_v34  ;;  %s2396_s14 = sshll.u32 %s2503_s24, 4  ;;  %s2397_s14 = int_to_ptr.vmem [resolvable:$false] %s2396_s14 }
  0xa7   : > { %p3035_p13 = scmp.ne.s32.totalorder %s3033_s5, 0  ;;  %s2398_s17 = scalar_lea.vmem %s2397_s14, 256 }
  0xa8   : > { %p2399_p10 = scmp.lt.s32.totalorder %s1696_s30, %s2397_s14  ;;  %p2400_p0 = scmp.lt.s32.totalorder %s2398_s17, %s2392_s6 }
  0xa9   : > { %1980 = vmatpush3.bf16.msra.mxu0 %v2185_v5  ;;  %p2394_p2 = pnand %p2393_p1, %p3035_p13 }
  0xaa   : > { %1991 = vmatprep.subr.bf16.mxu0 %v2495_v0  ;;  %s2923_s21 = scalar_lea.hbm %s3034_s11, %s1925_s26  ;;  %p2401_p12 = por %p2400_p0, %p2399_p10 }
  0xab   : > { %p2395_p11 = pneg %p2394_p2 }
  0xac   : > { %1982 = vmatmul.mubr.msk.bf16.vlgmr.msra.gmra.mxu0 %vm629_vm1, %v744_v6 }
  0xad   : > { %1993 = vmatprep.mubr.msk.bf16.mxu0 %vm2496_vm0, %v2495_v0  ;;  %p2402_p5 = pnand %p2401_p12, %p2395_p11 }
 0x164   : > { %v667_v8 = vpop.f32.mrf.mxu0  ;;  %v733_v25 = vpop.f32.mrf.mxu1 }
 0x165   : > { %v668_v9 = vadd.f32 %v1895_v7, %v667_v8  ;;  %v734_v26 = vadd.f32 %v1899_v24, %v733_v25 }
 0x166   : > { %v1967_v10 = vpop.f32.mrf.mxu0  ;;  %v1975_v27 = vpop.f32.mrf.mxu1 }
 0x167   : > { %v739_v11 = vpack.c.bf16 %v668_v9, %v668_v9 }
 0x168   : > { %v670_v12 = vpop.f32.mrf.mxu0 }
 0x169   : > { %741 = vst.msk [vmem:[#allocation2] sm:$0xf] %vm740_vm2, %v739_v11 }
 0x16a   : > { %v1968_v13 = vpop.f32.mrf.mxu0 }
 0x16c   : > { %v806_v14 = vpop.f32.mrf.mxu0 }
 0x16d   : > { %v807_v20 = vadd.f32 %v1903_v15, %v806_v14 }
 0x16e   : > { %v1983_v16 = vpop.f32.mrf.mxu0 }
 0x170   : > { %v898_v17 = vld [vmem:[#allocation2] sm:$0xf]  ;;  %v809_v18 = vpop.f32.mrf.mxu0 }
 0x171   : > { %906 = vrot.lane.b32.xlu1 %v898_v17, %s2497_s29  ;;  %900 = vrot.lane.b32.xlu0 %v898_v17, %s2498_s19 }
 0x172   : > { %v1984_v21 = vpop.f32.mrf.mxu0 }
 0x175   : > { %903 = vrot.lane.b32.xlu0 %v898_v17, %s2499_s15  ;;  %813 = vrot.lane.b32.xlu1 %v807_v20, %s2498_s19 }
 0x179   : > { %816 = vrot.lane.b32.xlu0 %v807_v20, %s2499_s15  ;;  %819 = vrot.lane.b32.xlu1 %v807_v20, %s2497_s29 }
 0x197   : > { %979 = vxpose.xlu0.c.b16.start.end [1/1] (short) (narrow) %v898_v17, 16 }
 0x1e3   : > { %v907_v28 = vpop.permute.xlu1 %906  ;;  %v901_v29 = vpop.permute.xlu0 %900 }
 0x1e4   : > { %995 = vxpose.xlu1.c.b16.start.end [1/1] (short) (narrow) %v901_v29, 16  ;;  %v736_v29 = vpop.f32.mrf.mxu1 }
 0x1e6   : > { %v1976_v30 = vpop.f32.mrf.mxu1 }
 0x1e7   : > { %v904_v36 = vpop.permute.xlu0 %903  ;;  %v814_v37 = vpop.permute.xlu1 %813 }
 0x1e8   : > { %1011 = vxpose.xlu0.c.b16.start.end [1/1] (short) (narrow) %v904_v36, 16  ;;  %2180 = vset.pattern.permute.xlu1 %v2502_v34 }
 0x1e9   : > { %1233 = vperm.xlu1 %2180, %v1231_v35  }
 0x1eb   : > { %v817_v40 = vpop.permute.xlu0 %816  ;;  %v820_v41 = vpop.permute.xlu1 %819 }
 0x1ec   : > { %v822_v42 = vcombine.low %v807_v20, %v817_v40  ;;  %v823_v43 = vcombine.high %v807_v20, %v817_v40  ;;  %v838_v44 = vcombine.low %v814_v37, %v820_v41  ;;  %v839_v45 = vcombine.high %v814_v37, %v820_v41  ;;  %1027 = vxpose.xlu0.c.b16.start.end [1/1] (short) (narrow) %v907_v28, 16 }
 0x1ed   : > { %v742_v28 = vpack.c.bf16 %v734_v26, %v734_v26 }
 0x1ee   : > { %v830_v47 = vrot.slane %v822_v42, %v829_v39  ;;  %v837_v48 = vrot.slane %v823_v43, %v829_v39  ;;  %v846_v49 = vrot.slane %v838_v44, %v829_v39  ;;  %v853_v50 = vrot.slane %v839_v45, %v829_v39 }
 0x1ef   : > { %743 = vst.msk [vmem:[#allocation3] sm:$0xf] %vm740_vm2, %v742_v28 }
 0x1f0   : > { %v854_v51 = vcombine.low %v830_v47, %v846_v49  ;;  %v855_v52 = vcombine.high %v830_v47, %v846_v49  ;;  %v870_v53 = vcombine.low %v837_v48, %v853_v50  ;;  %v871_v54 = vcombine.high %v837_v48, %v853_v50 }
 0x1f2   : > { %v862_v55 = vrot.slane %v854_v51, %v861_v46  ;;  %v869_v56 = vrot.slane %v855_v52, %v861_v46  ;;  %v878_v57 = vrot.slane %v870_v53, %v861_v46  ;;  %v885_v58 = vrot.slane %v871_v54, %v861_v46 }
 0x1f4   : > { %v886_v59 = vcombine.high %v862_v55, %v2495_v0  ;;  %v887_v60 = vcombine.high %v869_v56, %v2495_v0  ;;  %v888_v61 = vcombine.high %v878_v57, %v2495_v0  ;;  %v889_v62 = vcombine.high %v885_v58, %v2495_v0 }
 0x1f5   : > { %v1907_v63 = vpack.c.bf16 %v878_v57, %v862_v55  ;;  %v1908_v1 = vpack.c.bf16 %v885_v58, %v869_v56  ;;  %2181 = vset.pattern.permute.xlu0 %v2502_v34 }
 0x1f6   : > { %v1909_v2 = vpack.c.bf16 %v888_v61, %v886_v59  ;;  %v1910_v3 = vpack.c.bf16 %v889_v62, %v887_v60  ;;  %v2856_v37 = vld [vmem:[#allocation3] sm:$0xf] }
 0x1f7   : > { %v924_v4 = vrot.slane %v1907_v63, %v829_v39  ;;  %v932_v5 = vrot.slane %v1908_v1, %v829_v39  ;;  %v1292_v38 = vsel %vm1047_vm4, %v2856_v37, 0 }
 0x1f8   : > { %v949_v6 = vrot.slane %v1909_v2, %v829_v39  ;;  %v957_v7 = vrot.slane %v1910_v3, %v829_v39 }
 0x1f9   : > { %v933_v8 = vcombine.low %v924_v4, %v932_v5  ;;  %v987_v9 = vpop.trf.xlu0 }
 0x1fa   : > { %v958_v10 = vcombine.low %v949_v6, %v957_v7  ;;  %v1049_v11 = vsel %vm1047_vm4, %v987_v9, 0 }
 0x1fb   : > { %v940_v12 = vrot.slane %v933_v8, %v861_v46  ;;  %1986 = vmatpush3.bf16.msra.mxu1 %v1049_v11 }
 0x1fc   : > { %v965_v13 = vrot.slane %v958_v10, %v861_v46  ;;  %1997 = vmatprep.subr.bf16.mxu1 %v2495_v0 }
 0x1fd   : > { %v941_v14 = vcombine.high %v940_v12, %v2502_v34  ;;  %v970_v17 = vshrl.u32 %v940_v12, 16 }
 0x1fe   : > { %v969_v15 = vpack.i.b16 %v965_v13, %v940_v12  ;;  %v966_v16 = vcombine.high %v965_v13, %v2502_v34  ;;  %v971_v18 = vshrl.u32 %v965_v13, 16 }
 0x1ff   : > { %v976_v21 = vshrl.u32 %v941_v14, 16 }
 0x200   : > { %1988 = vmatmul.mubr.msk.bf16.vlgmr.msra.gmra.mxu1 %vm1043_vm5, %v969_v15  ;;  %v972_v19 = vpack.i.b16 %v971_v18, %v970_v17  ;;  %v975_v20 = vpack.i.b16 %v966_v16, %v941_v14  ;;  %v977_v22 = vshrl.u32 %v966_v16, 16 }
 0x201   : > { %1999 = vmatprep.mubr.msk.bf16.mxu1 %vm2496_vm0, %v2495_v0 }
 0x202   : > { %v978_v23 = vpack.i.b16 %v977_v22, %v976_v21 }
 0x246   : > { %v1003_v31 = vpop.trf.xlu1 }
 0x247   : > { %v1095_v32 = vsel %vm1047_vm4, %v1003_v31, 0 }
 0x248   : > { %1992 = vmatpush3.bf16.msra.mxu0 %v1095_v32 }
 0x249   : > { %2003 = vmatprep.subr.bf16.mxu0 %v2495_v0 }
 0x24a   : > { %v1019_v33 = vpop.trf.xlu0 }
 0x24b   : > { %v1141_v34 = vsel %vm1047_vm4, %v1019_v33, 0  ;;  %1994 = vmatmul.mubr.msk.bf16.vlgmr.msra.gmra.mxu0 %vm1043_vm5, %v972_v19 }
 0x24c   : > { %1998 = vmatpush3.bf16.msra.mxu1 %v1141_v34  ;;  %2005 = vmatprep.mubr.msk.bf16.mxu0 %vm2496_vm0, %v2495_v0 }
 0x24d   : > { %2009 = vmatprep.subr.bf16.mxu1 %v2495_v0 }
 0x24e   : > { %v1035_v35 = vpop.trf.xlu0 }
 0x24f   : > { %v1187_v36 = vsel %vm1047_vm4, %v1035_v35, 0  ;;  %2000 = vmatmul.mubr.msk.bf16.vlgmr.msra.gmra.mxu1 %vm1043_vm5, %v975_v20 }
 0x250   : > { %2004 = vmatpush3.bf16.msra.mxu0 %v1187_v36  ;;  %2011 = vmatprep.mubr.msk.bf16.mxu1 %vm2496_vm0, %v2495_v0 }
 0x251   : > { %2015 = vmatprep.subr.bf16.mxu0 %v2495_v0  ;;  %2010 = vmatpush3.bf16.msra.mxu1 %v1292_v38 }
 0x252   : > { %2021 = vmatprep.subr.bf16.mxu1 %v2495_v0 }
 0x253   : > { %2006 = vmatmul.mubr.msk.bf16.vlgmr.msra.gmra.mxu0 %vm1043_vm5, %v978_v23 }
 0x254   : > { %2017 = vmatprep.mubr.msk.bf16.mxu0 %vm2496_vm0, %v2495_v0 }
 0x264   : > { %v1234_v39 = vpop.permute.xlu1 %1233 }
 0x265   : > { %vm1235_vm6 = vcmp.eq.s32.totalorder %v1234_v39, 1 }
 0x2c0   : > { %v1085_v40 = vpop.f32.mrf.mxu1 }
 0x2c1   : > { %v1236_v41 = vsel %vm1235_vm6, -1e+09, %v1085_v40 }
 0x2c2   : > { %v1989_v42 = vpop.f32.mrf.mxu1  ;;  %v1240_v43 = vsel %vm1043_vm5, %v1236_v41, -inf }
 0x2c3   : > { %1241 = vmax.xlane.f32.xlu0 %v1240_v43 }
 0x2c4   : > { %v1088_v44 = vpop.f32.mrf.mxu1 }
 0x2c6   : > { %v1990_v45 = vpop.f32.mrf.mxu1 }
 0x2c7   : > { %v1477_v45 = vld [vmem:[#allocation15 + $0x4] sm:$0xf] }
 0x30b   : > { %v1131_v46 = vpop.f32.mrf.mxu0 }
 0x30c   : > { %v1237_v47 = vsel %vm1235_vm6, -1e+09, %v1131_v46  ;;  %v1530_v46 = vsel %vm1047_vm4, %v1477_v45, 0 }
 0x30d   : > { %v1995_v48 = vpop.f32.mrf.mxu0  ;;  %v1243_v49 = vsel %vm1043_vm5, %v1237_v47, -inf }
 0x30e   : > { %1244 = vmax.xlane.f32.xlu1 %v1243_v49 }
 0x30f   : > { %v1134_v50 = vpop.f32.mrf.mxu0  ;;  %v1177_v51 = vpop.f32.mrf.mxu1 }
 0x310   : > { %v1238_v52 = vsel %vm1235_vm6, -1e+09, %v1177_v51 }
 0x311   : > { %v1996_v53 = vpop.f32.mrf.mxu0  ;;  %v2001_v54 = vpop.f32.mrf.mxu1  ;;  %v1246_v55 = vsel %vm1043_vm5, %v1238_v52, -inf }
 0x312   : > { %1247 = vmax.xlane.f32.xlu0 %v1246_v55  ;;  %v1479_v54 = vld [vmem:[#allocation15 + $0xc] sm:$0xf] }
 0x313   : > { %v1180_v56 = vpop.f32.mrf.mxu1  ;;  %v1223_v57 = vpop.f32.mrf.mxu0 }
 0x314   : > { %v1239_v58 = vsel %vm1235_vm6, -1e+09, %v1223_v57  ;;  %v1622_v57 = vsel %vm1047_vm4, %v1479_v54, 0 }
 0x315   : > { %v2002_v59 = vpop.f32.mrf.mxu1  ;;  %v2007_v60 = vpop.f32.mrf.mxu0  ;;  %v1249_v61 = vsel %vm1043_vm5, %v1239_v58, -inf }
 0x316   : > { %1250 = vmax.xlane.f32.xlu0 %v1249_v61 }
 0x317   : > { %v1226_v62 = vpop.f32.mrf.mxu0 }
 0x319   : > { %v2008_v63 = vpop.f32.mrf.mxu0 }
 0x31f   : > { %913 = vrot.lane.b32.xlu1 %v2856_v37, %s2499_s15  ;;  %s1681_s15 = scalar_lea.sflag [#allocation6], %s2753_s16 }
 0x323   : > { %915 = vrot.lane.b32.xlu1 %v2856_v37, %s2497_s29 }
 0x34c   : > { %v1242_v1 = vpop.xlane.xlu0 %1241 }
 0x34d   : > { %v1252_v2 = vsub.f32 %v1236_v41, %v1242_v1 }
 0x34f   : > { %v1256_v3 = vmul.f32 1.442695, %v1252_v2 }
 0x351   : > { %2188 = vpow2.f32 %v1256_v3 }
 0x35e   : > { %v2189_v4 = vpop.eup %2188 }
 0x35f   : > { %v1264_v5 = vsel %vm1043_vm5, %v2189_v4, 0.0 }
 0x360   : > { %1265 = vadd.xlane.f32.xlu0 %v1264_v5 }
 0x397   : > { %v1245_v6 = vpop.xlane.xlu1 %1244 }
 0x398   : > { %v1253_v7 = vsub.f32 %v1237_v47, %v1245_v6  ;;  %v1478_v47 = vld [vmem:[#allocation15 + $0x8] sm:$0xf] }
 0x399   : > { %v1576_v50 = vsel %vm1047_vm4, %v1478_v47, 0 }
 0x39a   : > { %v1258_v8 = vmul.f32 1.442695, %v1253_v7 }
 0x39b   : > { %v1248_v9 = vpop.xlane.xlu0 %1247  ;;  %v914_v24 = vpop.permute.xlu1 %913 }
 0x39c   : > { %2190 = vpow2.f32 %v1258_v8  ;;  %v1254_v10 = vsub.f32 %v1238_v52, %v1248_v9  ;;  %v1384_v26 = vsel %vm1047_vm4, %v914_v24, 0 }
 0x39e   : > { %v1260_v11 = vmul.f32 1.442695, %v1254_v10 }
 0x39f   : > { %v1251_v12 = vpop.xlane.xlu0 %1250  ;;  %v916_v34 = vpop.permute.xlu1 %915 }
 0x3a0   : > { %2192 = vpow2.f32 %v1260_v11  ;;  %v1255_v13 = vsub.f32 %v1239_v58, %v1251_v12  ;;  %v1430_v38 = vsel %vm1047_vm4, %v916_v34, 0 }
 0x3a2   : > { %v1262_v14 = vmul.f32 1.442695, %v1255_v13 }
 0x3a4   : > { %2194 = vpow2.f32 %v1262_v14 }
 0x3a9   : > { %v2191_v15 = vpop.eup %2190 }
 0x3aa   : > { %v1267_v16 = vsel %vm1043_vm5, %v2191_v15, 0.0 }
 0x3ab   : > { %1268 = vadd.xlane.f32.xlu0 %v1267_v16 }
 0x3ad   : > { %v2193_v17 = vpop.eup %2192 }
 0x3ae   : > { %v1270_v18 = vsel %vm1043_vm5, %v2193_v17, 0.0 }
 0x3af   : > { %1271 = vadd.xlane.f32.xlu0 %v1270_v18 }
 0x3b1   : > { %v2195_v19 = vpop.eup %2194 }
 0x3b2   : > { %v1273_v20 = vsel %vm1043_vm5, %v2195_v19, 0.0 }
 0x3b3   : > { %1274 = vadd.xlane.f32.xlu0 %v1273_v20 }
 0x3c9   : > { %911 = vrot.lane.b32.xlu0 %v2856_v37, %s2498_s19  ;;  %v1476_v37 = vld [vmem:[#allocation15] sm:$0xf] }
 0x3ca   : > { %v1484_v41 = vsel %vm1047_vm4, %v1476_v37, 0 }
 0x3e9   : > { %v1266_v21 = vpop.xlane.xlu0 %1265 }
 0x3ea   : > { %2196 = vrcp.f32 %v1266_v21 }
 0x3f7   : > { %v2197_v22 = vpop.eup %2196 }
 0x3f8   : > { %v1280_v23 = vmul.f32 %v2197_v22, %v2189_v4 }
 0x3fa   : > { %v1284_v25 = vpack.c.bf16 %v1280_v23, %v1280_v23 }
 0x3fc   : > { %2012 = vmatmul.mubr.msk.bf16.vlgmr.msra.gmra.mxu1 %vm1043_vm5, %v1284_v25  ;;  %v1923_v25 = vld [vmem:[%s3032_s20] ss:$0 sm:$0xff] }
 0x3fd   : > { %2022 = vmatpush3.bf16.msra.mxu1 %v1384_v26  ;;  %2023 = vmatprep.mubr.msk.bf16.mxu1 %vm2496_vm0, %v2495_v0 }
 0x3fe   : > { %2033 = vmatprep.subr.bf16.mxu1 %v2495_v0 }
 0x434   : > { %v1269_v27 = vpop.xlane.xlu0 %1268 }
 0x435   : > { %2198 = vrcp.f32 %v1269_v27 }
 0x438   : > { %v1272_v28 = vpop.xlane.xlu0 %1271 }
 0x439   : > { %2200 = vrcp.f32 %v1272_v28 }
 0x43c   : > { %v1275_v29 = vpop.xlane.xlu0 %1274 }
 0x43d   : > { %2202 = vrcp.f32 %v1275_v29 }
 0x440   : > { %v912_v30 = vpop.permute.xlu0 %911 }
 0x441   : > { %v1338_v31 = vsel %vm1047_vm4, %v912_v30, 0 }
 0x442   : > { %v2199_v32 = vpop.eup %2198  ;;  %2016 = vmatpush3.bf16.msra.mxu0 %v1338_v31 }
 0x443   : > { %2027 = vmatprep.subr.bf16.mxu0 %v2495_v0  ;;  %v1281_v33 = vmul.f32 %v2199_v32, %v2191_v15 }
 0x445   : > { %v1285_v35 = vpack.c.bf16 %v1281_v33, %v1281_v33 }
 0x446   : > { %v2201_v36 = vpop.eup %2200 }
 0x447   : > { %2018 = vmatmul.mubr.msk.bf16.vlgmr.msra.gmra.mxu0 %vm1043_vm5, %v1285_v35  ;;  %v1282_v39 = vmul.f32 %v2201_v36, %v2193_v17 }
 0x448   : > { %2028 = vmatpush3.bf16.msra.mxu0 %v1430_v38  ;;  %2029 = vmatprep.mubr.msk.bf16.mxu0 %vm2496_vm0, %v2495_v0 }
 0x449   : > { %v1286_v40 = vpack.c.bf16 %v1282_v39, %v1282_v39  ;;  %2039 = vmatprep.subr.bf16.mxu0 %v2495_v0 }
 0x44a   : > { %v2203_v42 = vpop.eup %2202 }
 0x44b   : > { %2024 = vmatmul.mubr.msk.bf16.vlgmr.msra.gmra.mxu1 %vm1043_vm5, %v1286_v40  ;;  %v1283_v43 = vmul.f32 %v2203_v42, %v2195_v19 }
 0x44c   : > { %2034 = vmatpush3.bf16.msra.mxu1 %v1484_v41  ;;  %2035 = vmatprep.mubr.msk.bf16.mxu1 %vm2496_vm0, %v2495_v0 }
 0x44d   : > { %v1287_v44 = vpack.c.bf16 %v1283_v43, %v1283_v43  ;;  %2045 = vmatprep.subr.bf16.mxu1 %v2495_v0 }
 0x44f   : > { %2030 = vmatmul.mubr.msk.bf16.vlgmr.msra.gmra.mxu0 %vm1043_vm5, %v1287_v44 }
 0x450   : > { %2041 = vmatprep.mubr.msk.bf16.mxu0 %vm2496_vm0, %v2495_v0  ;;  %2040 = vmatpush3.bf16.msra.mxu0 %v1530_v46 }
 0x451   : > { %2051 = vmatprep.subr.bf16.mxu0 %v2495_v0 }
 0x4bc   : > { %v1328_v48 = vpop.f32.mrf.mxu1 }
 0x4bd   : > { %v1472_v49 = vpack.c.bf16 %v1328_v48, %v1328_v48 }
 0x4be   : > { %v2013_v51 = vpop.f32.mrf.mxu1 }
 0x4bf   : > { %2036 = vmatmul.mubr.msk.bf16.vlgmr.msra.gmra.mxu1 %vm1043_vm5, %v1472_v49 }
 0x4c0   : > { %v1331_v52 = vpop.f32.mrf.mxu1  ;;  %2046 = vmatpush3.bf16.msra.mxu1 %v1576_v50  ;;  %2047 = vmatprep.mubr.msk.bf16.mxu1 %vm2496_vm0, %v2495_v0 }
 0x4c2   : > { %v2014_v53 = vpop.f32.mrf.mxu1 }
 0x507   : > { %v1374_v55 = vpop.f32.mrf.mxu0 }
 0x508   : > { %v1473_v56 = vpack.c.bf16 %v1374_v55, %v1374_v55 }
 0x509   : > { %v2019_v58 = vpop.f32.mrf.mxu0 }
 0x50a   : > { %2042 = vmatmul.mubr.msk.bf16.vlgmr.msra.gmra.mxu0 %vm1043_vm5, %v1473_v56 }
 0x50b   : > { %v1377_v59 = vpop.f32.mrf.mxu0  ;;  %v1420_v60 = vpop.f32.mrf.mxu1  ;;  %2052 = vmatpush3.bf16.msra.mxu0 %v1622_v57  ;;  %2053 = vmatprep.mubr.msk.bf16.mxu0 %vm2496_vm0, %v2495_v0 }
 0x50c   : > { %v1474_v61 = vpack.c.bf16 %v1420_v60, %v1420_v60 }
 0x50d   : > { %v2020_v62 = vpop.f32.mrf.mxu0  ;;  %v2025_v63 = vpop.f32.mrf.mxu1 }
 0x50e   : > { %2048 = vmatmul.mubr.msk.bf16.vlgmr.msra.gmra.mxu1 %vm1043_vm5, %v1474_v61 }
 0x50f   : > { %v1423_v1 = vpop.f32.mrf.mxu1  ;;  %v1466_v2 = vpop.f32.mrf.mxu0 }
 0x510   : > { %v1475_v3 = vpack.c.bf16 %v1466_v2, %v1466_v2 }
 0x511   : > { %v2026_v4 = vpop.f32.mrf.mxu1  ;;  %v2031_v5 = vpop.f32.mrf.mxu0 }
 0x512   : > { %2054 = vmatmul.mubr.msk.bf16.vlgmr.msra.gmra.mxu0 %vm1043_vm5, %v1475_v3 }
 0x513   : > { %v1469_v6 = vpop.f32.mrf.mxu0 }
 0x515   : > { %v2032_v7 = vpop.f32.mrf.mxu0 }
 0x57f   : > { %v1520_v8 = vpop.f32.mrf.mxu1 }
 0x580   : > { %v1664_v16 = vsel %vm629_vm1, %v1520_v8, 0.0 }
 0x581   : > { %v2037_v9 = vpop.f32.mrf.mxu1 }
 0x583   : > { %v1523_v10 = vpop.f32.mrf.mxu1 }
 0x585   : > { %v2038_v11 = vpop.f32.mrf.mxu1 }
 0x5ca   : > { %v1566_v0 = vpop.f32.mrf.mxu0 }
 0x5cb   : > { %v1665_v13 = vsel %vm629_vm1, %v1566_v0, 0.0 }
 0x5cc   : > { %v2043_v12 = vpop.f32.mrf.mxu0  ;;  %v1666_v18 = vadd.f32 %v1665_v13, %v1664_v16 }
 0x5ce   : > { %v1569_v14 = vpop.f32.mrf.mxu0  ;;  %v1612_v15 = vpop.f32.mrf.mxu1 }
 0x5cf   : > { %v1667_v17 = vsel %vm629_vm1, %v1612_v15, 0.0 }
 0x5d0   : > { %v2044_v19 = vpop.f32.mrf.mxu0  ;;  %v2049_v20 = vpop.f32.mrf.mxu1  ;;  %v1668_v21 = vadd.f32 %v1667_v17, %v1666_v18 }
 0x5d2   : > { %v1615_v22 = vpop.f32.mrf.mxu1  ;;  %v1658_v23 = vpop.f32.mrf.mxu0 }
 0x5d3   : > { %v1669_v24 = vsel %vm629_vm1, %v1658_v23, 0.0 }
 0x5d4   : > { %v1670_v26 = vadd.f32 %v1669_v24, %v1668_v21  ;;  %v2050_v27 = vpop.f32.mrf.mxu1  ;;  %v2055_v28 = vpop.f32.mrf.mxu0 }
 0x5d6   : > { %v1678_v29 = vadd.f32 %v1923_v25, %v1670_v26  ;;  %v1661_v30 = vpop.f32.mrf.mxu0 }
 0x5d8   : > { %v2056_v31 = vpop.f32.mrf.mxu0  ;;  %1679 = vst.msk [vmem:[%s591_s18] sm:$0xff] %vm629_vm1, %v1678_v29 }
 0x5d9   : > { %2405 = shalt.err (!%p2402_p5)
}
 0x5da   : > { %s2406_s25 = scalar_lea.hbm %s2923_s21, 128  ;;  %s2410_s13 = scalar_lea.hbm %s3034_s11, 256 }
 0x5db   : > { %p2407_p6 = scmp.ne.s32.totalorder %s2923_s21, %s2406_s25  ;;  %p2411_p7 = scmp.lt.s32.totalorder %s2923_s21, %s3034_s11 }
 0x5dc   : > { %p2412_p8 = scmp.lt.s32.totalorder %s2410_s13, %s2406_s25 }
 0x5dd   : > { %p2408_p4 = pnand %p2407_p6, %p3035_p13 }
 0x5de   : > { %p2413_p9 = por %p2412_p8, %p2411_p7 }
 0x5df   : > { %p2409_p3 = pneg %p2408_p4 }
 0x5e1   : > { %p2414_p1 = pnand %p2413_p9, %p2409_p3 }
 0x5e3   : > { %2417 = shalt.err (!%p2414_p1)
}
 0x5e4   : > { %2079 = dma.vmem_to_hbm [thread:$0]  (%p3035_p13), %s1696_s30, 128, %s2923_s21, %s1681_s15  }
 0x5e5 PF: > { %s3036_s2 = sld [smem:[#allocation22_spill]] }
 0x5e6   : > { %s3037_s27 = sld [smem:[#allocation28_spill]] }
 0x5e7   : > { %s3038_s20 = sld [smem:[#allocation24_spill]] }
 0x5eb   : > { %s1707_s26 = sand.u32 1, %s3036_s2  }
 0x5ec   : > { %p3039_p2 = scmp.ne.s32.totalorder %s3037_s27, 0  ;;  %s1708_s18 = scalar_lea.sflag [#allocation6], %s1707_s26 }
 0x5ed   : > { %p3040_p11 = scmp.ge.s32.totalorder %s3038_s20, 2 }
 0x5ef   : > { %p2105_p10 = pnand %p3040_p11, %p3039_p2 }
 0x5f1   : > { %p2106_p0 = pneg %p2105_p10 }
 0x5f3   : > { %2459 = dma.done.wait (%p2106_p0), %s1708_s18, 128  }
 0x5f4   : > { %2461 = vsyncadd (%p2106_p0), %s1708_s18, 4294967168  ;;  %s33_s26 = sadd.s32 1, %s3038_s20   ;;  %s3041_s5 = sld [smem:[#allocation27_spill]] }
 0x5f5   : > { %p30_p12 = scmp.ge.s32.totalorder %s33_s26, 4   ;;  %s3042_s24 = sld [smem:[#allocation23_spill]] }
 0x5f6   : > { %s3043_s25 = sld [smem:[#allocation25_spill]]  ;;  %s3044_s21 = smov %s2468_s22 }
 0x5f7   : > { %s3045_s22 = smov %s2472_s23  ;;  %32 = sbr.rel (!%p30_p12) target bundleno = 17 (0x11), region = 160 }
 0x5fa   : > { %s3046_s23 = smov %s3041_s5 }
 0x5fc   :  { %1713 = vsyncpa [#allocation5], 1 }
 0x5fd   :  { %1715 = vsyncpa [#allocation5 + $0x1], 1 }
 0x5fe   :  { %1716 = vsyncpa [#allocation8], 1 }
 0x5ff   :  { %1718 = vsyncpa [#allocation8 + $0x1], 1 }
 0x600   :  { %1719 = vsyncpa [#allocation11], 1 }
 0x601   :  { %1720 = vsyncpa [#allocation14], 1 }
 0x602   :  { %1721 = vsyncpa [#allocation6], 1 }
 0x603   :  { %1723 = vsyncpa [#allocation6 + $0x1], 1 }

</bundles_post_ra>
